<compile_context>
chip_gen: v7x
topology: tpu7x:2x2x1
jax: 0.10.0
libtpu: 0.0.40
codegen_flags: <defaults>
</compile_context>

<pallas_src>
import jax
import jax.numpy as jnp
from jax import lax
from jax.experimental import pallas as pl
from jax.experimental.pallas import tpu as pltpu


# ----------------------------------------------------------------------------
# helpers
# ----------------------------------------------------------------------------
def _full_spec(shape):
    """BlockSpec mapping the whole array into VMEM (no grid)."""
    nd = len(shape)
    return pl.BlockSpec(shape, lambda *_: (0,) * nd)


# ----------------------------------------------------------------------------
# one fused kernel for the whole forward pass
# ----------------------------------------------------------------------------
def _make_fused_kernel(block_cfgs, *, B, T, K, P):
    """block_cfgs: static list of dicts {'cin','cout','dilation','has_ds'}."""

    def kernel(*refs):
        # ---- unpack refs: inputs..., output, scratch ----
        idx = 0
        x_ref = refs[idx]; idx += 1
        blk_refs = []
        for cfg in block_cfgs:
            n = 6 if cfg['has_ds'] else 4
            blk_refs.append(refs[idx:idx + n])
            idx += n
        ln_g, ln_b, w_fc1, b_fc1, w_fc2, b_fc2 = refs[idx:idx + 6]
        idx += 6
        o_ref = refs[idx]
        slab = refs[idx + 1]                 # VMEM scratch (B, P + T, Cmax)

        # Zero the causal-pad rows once; they are never overwritten.
        slab[:, 0:P, :] = jnp.zeros((B, P, slab.shape[2]), jnp.float32)

        def causal_conv(h, w_ref, b_ref, cin, dilation):
            """h: (B*T, cin) value -> (B*T, cout) via a single im2col matmul."""
            # Activation lives at sublane-aligned offset P of the slab;
            # rows [0, P) are zeros => causal left-pad for free.
            slab[:, P:P + T, 0:cin] = h.reshape(B, T, cin)
            cols = []
            for k in range(K):
                shift = (K - 1 - k) * dilation                 # static
                xs = slab[:, P - shift:P - shift + T, 0:cin]   # (B, T, cin)
                cols.append(xs.reshape(B * T, cin))
            im2col = cols[0] if K == 1 else jnp.concatenate(cols, axis=-1)
            y = jnp.dot(im2col, w_ref[...], preferred_element_type=jnp.float32)
            return y + b_ref[...]

        # ---- TCN blocks (dropout = identity in eval) ----
        h = x_ref[...].astype(jnp.float32).reshape(B * T, block_cfgs[0]['cin'])
        for cfg, r in zip(block_cfgs, blk_refs):
            d = cfg['dilation']
            if cfg['has_ds']:
                w1, b1, w2, b2, w_ds, b_ds = r
            else:
                w1, b1, w2, b2 = r
            c1 = jnp.maximum(causal_conv(h, w1, b1, cfg['cin'], d), 0.0)
            c2 = jnp.maximum(causal_conv(c1, w2, b2, cfg['cout'], d), 0.0)
            if cfg['has_ds']:
                res = jnp.dot(h, w_ds[...],
                              preferred_element_type=jnp.float32) + b_ds[...]
            else:
                res = h
            h = jnp.maximum(c2 + res, 0.0)           # fused residual add + ReLU

        # ---- global attention head ----
        C = block_cfgs[-1]['cout']
        out3 = h.reshape(B, T, C)
        aw = jnp.mean(out3, axis=2, keepdims=True)          # (B, T, 1)
        aw = aw - jnp.max(aw, axis=1, keepdims=True)
        e = jnp.exp(aw)
        p = e / jnp.sum(e, axis=1, keepdims=True)           # softmax over T
        pooled = jnp.sum(p * out3, axis=1)                  # (B, C) attention pool

        mu = jnp.mean(pooled, axis=1, keepdims=True)        # LayerNorm (eps=1e-5)
        var = jnp.mean(jnp.square(pooled - mu), axis=1, keepdims=True)
        ln = (pooled - mu) * lax.rsqrt(var + 1e-5)
        ln = ln * ln_g[...] + ln_b[...]

        h1 = jnp.maximum(
            jnp.dot(ln, w_fc1[...], preferred_element_type=jnp.float32)
            + b_fc1[...], 0.0)
        logits = jnp.dot(h1, w_fc2[...],
                         preferred_element_type=jnp.float32) + b_fc2[...]
        o_ref[...] = logits.astype(o_ref.dtype)

    return kernel


# ----------------------------------------------------------------------------
# wrapper
# ----------------------------------------------------------------------------
def tcn_global_attention_forward(x, blocks, head):
    """x: (B, T, input_dim). torch permutes to NCW; we stay channel-last."""
    B, T, D = x.shape
    K = blocks[0]['kernel_size']
    num_classes = head['w_fc2'].shape[1]

    block_cfgs, args, cin = [], [x], D
    for blk in blocks:
        cout = blk['w2'].shape[1]
        cfg = {'cin': cin, 'cout': cout, 'dilation': blk['dilation'],
               'has_ds': 'w_ds' in blk}
        block_cfgs.append(cfg)
        args += [blk['w1'], blk['b1'], blk['w2'], blk['b2']]
        if cfg['has_ds']:
            args += [blk['w_ds'], blk['b_ds']]
        cin = cout
    args += [head['ln_g'], head['ln_b'], head['w_fc1'], head['b_fc1'],
             head['w_fc2'], head['b_fc2']]

    max_pad = max((K - 1) * c['dilation'] for c in block_cfgs)
    P = max(8, -(-max_pad // 8) * 8)        # sublane-aligned causal pad rows
    Cmax = max(max(c['cin'], c['cout']) for c in block_cfgs)

    kernel = _make_fused_kernel(block_cfgs, B=B, T=T, K=K, P=P)
    return pl.pallas_call(
        kernel,
        out_shape=jax.ShapeDtypeStruct((B, num_classes), jnp.float32),
        in_specs=[_full_spec(a.shape) for a in args],
        out_specs=_full_spec((B, num_classes)),
        scratch_shapes=[pltpu.VMEM((B, P + T, Cmax), jnp.float32)],
        # TODO(synk): at realistic (B, T) add a grid over B / T-tiles (halo =
        # (K-1)*dilation) with dimension_semantics=("parallel",) to use both
        # v7x TensorCores and bound VMEM residency; consider bf16 weights/acts
        # with f32 accumulation on v6e/v7x.
    )(*args)


# ----------------------------------------------------------------------------
# pure-JAX reference (mirrors the torch module) for runtime self-check
# ----------------------------------------------------------------------------
def _reference_forward(x, blocks, head):
    hp = lax.Precision.HIGHEST
    B, T, _ = x.shape
    h = x.astype(jnp.float32)
    for blk in blocks:
        K, d = blk['kernel_size'], blk['dilation']

        def conv(z, w_flat, b):
            ci = z.shape[-1]
            w = w_flat.reshape(K, ci, -1)
            pad = (K - 1) * d
            zp = jnp.pad(z, ((0, 0), (pad, 0), (0, 0)))
            y = sum(jnp.einsum('btc,cf->btf', zp[:, k * d:k * d + T, :], w[k],
                               precision=hp) for k in range(K))
            return y + b

        c1 = jax.nn.relu(conv(h, blk['w1'], blk['b1']))
        c2 = jax.nn.relu(conv(c1, blk['w2'], blk['b2']))
        if 'w_ds' in blk:
            res = jnp.einsum('btc,cf->btf', h, blk['w_ds'],
                             precision=hp) + blk['b_ds']
        else:
            res = h
        h = jax.nn.relu(c2 + res)

    aw = jax.nn.softmax(jnp.mean(h, axis=2), axis=-1)        # (B, T)
    pooled = jnp.einsum('bt,btc->bc', aw, h, precision=hp)
    mu = pooled.mean(-1, keepdims=True)
    var = ((pooled - mu) ** 2).mean(-1, keepdims=True)
    ln = (pooled - mu) / jnp.sqrt(var + 1e-5) * head['ln_g'] + head['ln_b']
    h1 = jax.nn.relu(jnp.dot(ln, head['w_fc1'], precision=hp) + head['b_fc1'])
    return jnp.dot(h1, head['w_fc2'], precision=hp) + head['b_fc2']


# ----------------------------------------------------------------------------
# deterministic synthetic parameters (mirrors the module's shapes)
# ----------------------------------------------------------------------------
def init_params(key, input_dim, num_channels, kernel_size, num_classes):
    keys = iter(jax.random.split(key, 32))

    def nrm(shape, scale):
        return scale * jax.random.normal(next(keys), shape, jnp.float32)

    blocks, cin = [], input_dim
    for i, cout in enumerate(num_channels):
        d = 2 ** i
        # weight_norm folded: effective conv weight ~ N(0, 0.01), as in init_weights()
        w1 = nrm((kernel_size, cin, cout), 0.01).reshape(kernel_size * cin, cout)
        w2 = nrm((kernel_size, cout, cout), 0.01).reshape(kernel_size * cout, cout)
        blk = {'w1': w1, 'b1': nrm((1, cout), 0.1),
               'w2': w2, 'b2': nrm((1, cout), 0.1),
               'dilation': d, 'kernel_size': kernel_size}
        if cin != cout:
            blk['w_ds'] = nrm((cin, cout), 0.01)
            blk['b_ds'] = nrm((1, cout), 0.1)
        blocks.append(blk)
        cin = cout

    C = num_channels[-1]
    head = {'ln_g': jnp.ones((1, C), jnp.float32),
            'ln_b': jnp.zeros((1, C), jnp.float32),
            'w_fc1': nrm((C, C), 0.05), 'b_fc1': nrm((1, C), 0.05),
            'w_fc2': nrm((C, num_classes), 0.05),
            'b_fc2': nrm((1, num_classes), 0.05)}
    return blocks, head


# ----------------------------------------------------------------------------
if __name__ == "__main__":
    key = jax.random.PRNGKey(0)
    k_x, k_p = jax.random.split(key)

    B, T, input_dim, num_classes = 2, 16, 8, 10
    num_channels, kernel_size = [64, 128], 3

    x = jax.random.normal(k_x, (B, T, input_dim), jnp.float32)
    blocks, head = init_params(k_p, input_dim, num_channels, kernel_size,
                               num_classes)

    out = jax.block_until_ready(tcn_global_attention_forward(x, blocks, head))
    assert out.shape == (B, num_classes), out.shape
    assert bool(jnp.all(jnp.isfinite(out)))

    ref = jax.block_until_ready(_reference_forward(x, blocks, head))
    assert bool(jnp.allclose(out, ref, rtol=1e-3, atol=1e-3)), \
        float(jnp.max(jnp.abs(out - ref)))

    print("KERNEL_OK")
</pallas_src>

<mosaic_0001>
module attributes {stable_mosaic.version = 11 : i64} {
  func.func @kernel(%arg0: memref<2x16x8xf32, #tpu.memory_space<vmem>>, %arg1: memref<24x64xf32, #tpu.memory_space<vmem>>, %arg2: memref<1x64xf32, #tpu.memory_space<vmem>>, %arg3: memref<192x64xf32, #tpu.memory_space<vmem>>, %arg4: memref<1x64xf32, #tpu.memory_space<vmem>>, %arg5: memref<8x64xf32, #tpu.memory_space<vmem>>, %arg6: memref<1x64xf32, #tpu.memory_space<vmem>>, %arg7: memref<192x128xf32, #tpu.memory_space<vmem>>, %arg8: memref<1x128xf32, #tpu.memory_space<vmem>>, %arg9: memref<384x128xf32, #tpu.memory_space<vmem>>, %arg10: memref<1x128xf32, #tpu.memory_space<vmem>>, %arg11: memref<64x128xf32, #tpu.memory_space<vmem>>, %arg12: memref<1x128xf32, #tpu.memory_space<vmem>>, %arg13: memref<1x128xf32, #tpu.memory_space<vmem>>, %arg14: memref<1x128xf32, #tpu.memory_space<vmem>>, %arg15: memref<128x128xf32, #tpu.memory_space<vmem>>, %arg16: memref<1x128xf32, #tpu.memory_space<vmem>>, %arg17: memref<128x10xf32, #tpu.memory_space<vmem>>, %arg18: memref<1x10xf32, #tpu.memory_space<vmem>>, %arg19: memref<2x10xf32, #tpu.memory_space<vmem>>, %arg20: memref<2x24x128xf32, #tpu.memory_space<vmem>>) attributes {dimension_semantics = [], scalar_prefetch = 0 : i64, scratch_operands = 1 : i64, tpu.core_type = #tpu.core_type<tc>} {
    %cst = arith.constant 0.000000e+00 : f32
    %0 = vector.broadcast %cst : f32 to vector<2x8x128xf32>
    %c0 = arith.constant 0 : index
    %c0_0 = arith.constant 0 : index
    %c0_1 = arith.constant 0 : index
    %1 = vector.load %arg20[%c0, %c0_0, %c0_1] : memref<2x24x128xf32, #tpu.memory_space<vmem>>, vector<2x8x128xf32>
    tpu.vector_store %arg20[%c0, %c0_0, %c0_1], %0 {strides = array<i32>} : memref<2x24x128xf32, #tpu.memory_space<vmem>>, vector<2x8x128xf32>,
    %c0_2 = arith.constant 0 : index
    %c0_3 = arith.constant 0 : index
    %c0_4 = arith.constant 0 : index
    %2 = vector.load %arg0[%c0_2, %c0_3, %c0_4] : memref<2x16x8xf32, #tpu.memory_space<vmem>>, vector<2x16x8xf32>
    %3 = vector.shape_cast %2 : vector<2x16x8xf32> to vector<32x8xf32>
    %4 = vector.shape_cast %3 : vector<32x8xf32> to vector<2x16x8xf32>
    %c0_5 = arith.constant 0 : index
    %c8 = arith.constant 8 : index
    %c0_6 = arith.constant 0 : index
    %5 = vector.load %arg20[%c0_5, %c8, %c0_6] : memref<2x24x128xf32, #tpu.memory_space<vmem>>, vector<2x16x8xf32>
    tpu.vector_store %arg20[%c0_5, %c8, %c0_6], %4 {strides = array<i32>} : memref<2x24x128xf32, #tpu.memory_space<vmem>>, vector<2x16x8xf32>,
    %c0_7 = arith.constant 0 : index
    %c6 = arith.constant 6 : index
    %c0_8 = arith.constant 0 : index
    %6 = vector.load %arg20[%c0_7, %c6, %c0_8] : memref<2x24x128xf32, #tpu.memory_space<vmem>>, vector<2x16x8xf32>
    %7 = vector.shape_cast %6 : vector<2x16x8xf32> to vector<32x8xf32>
    %c0_9 = arith.constant 0 : index
    %c7 = arith.constant 7 : index
    %c0_10 = arith.constant 0 : index
    %8 = vector.load %arg20[%c0_9, %c7, %c0_10] : memref<2x24x128xf32, #tpu.memory_space<vmem>>, vector<2x16x8xf32>
    %9 = vector.shape_cast %8 : vector<2x16x8xf32> to vector<32x8xf32>
    %c0_11 = arith.constant 0 : index
    %c8_12 = arith.constant 8 : index
    %c0_13 = arith.constant 0 : index
    %10 = vector.load %arg20[%c0_11, %c8_12, %c0_13] : memref<2x24x128xf32, #tpu.memory_space<vmem>>, vector<2x16x8xf32>
    %11 = vector.shape_cast %10 : vector<2x16x8xf32> to vector<32x8xf32>
    %12 = tpu.concatenate %7, %9, %11 in 1 : vector<32x8xf32>, vector<32x8xf32>, vector<32x8xf32> -> vector<32x24xf32>
    %c0_14 = arith.constant 0 : index
    %c0_15 = arith.constant 0 : index
    %13 = vector.load %arg1[%c0_14, %c0_15] : memref<24x64xf32, #tpu.memory_space<vmem>>, vector<24x64xf32>
    %cst_16 = arith.constant dense<0.000000e+00> : vector<32x64xf32>
    %14 = tpu.matmul %12, %13, %cst_16 {dimension_numbers = #tpu.dot_dimension_numbers<[1], [0], [0], [1], [0, 0, 1, 1], [], []>} : vector<32x24xf32>, vector<24x64xf32>, vector<32x64xf32> -> vector<32x64xf32>
    %c0_17 = arith.constant 0 : index
    %c0_18 = arith.constant 0 : index
    %15 = vector.load %arg2[%c0_17, %c0_18] : memref<1x64xf32, #tpu.memory_space<vmem>>, vector<1x64xf32>
    %16 = vector.broadcast %15 : vector<1x64xf32> to vector<32x64xf32>
    %17 = arith.addf %14, %16 : vector<32x64xf32>
    %cst_19 = arith.constant 0.000000e+00 : f32
    %18 = vector.broadcast %cst_19 : f32 to vector<32x64xf32>
    %19 = arith.maximumf %17, %18 : vector<32x64xf32>
    %20 = vector.shape_cast %19 : vector<32x64xf32> to vector<2x16x64xf32>
    %c0_20 = arith.constant 0 : index
    %c8_21 = arith.constant 8 : index
    %c0_22 = arith.constant 0 : index
    %21 = vector.load %arg20[%c0_20, %c8_21, %c0_22] : memref<2x24x128xf32, #tpu.memory_space<vmem>>, vector<2x16x64xf32>
    tpu.vector_store %arg20[%c0_20, %c8_21, %c0_22], %20 {strides = array<i32>} : memref<2x24x128xf32, #tpu.memory_space<vmem>>, vector<2x16x64xf32>,
    %c0_23 = arith.constant 0 : index
    %c6_24 = arith.constant 6 : index
    %c0_25 = arith.constant 0 : index
    %22 = vector.load %arg20[%c0_23, %c6_24, %c0_25] : memref<2x24x128xf32, #tpu.memory_space<vmem>>, vector<2x16x64xf32>
    %23 = vector.shape_cast %22 : vector<2x16x64xf32> to vector<32x64xf32>
    %c0_26 = arith.constant 0 : index
    %c7_27 = arith.constant 7 : index
    %c0_28 = arith.constant 0 : index
    %24 = vector.load %arg20[%c0_26, %c7_27, %c0_28] : memref<2x24x128xf32, #tpu.memory_space<vmem>>, vector<2x16x64xf32>
    %25 = vector.shape_cast %24 : vector<2x16x64xf32> to vector<32x64xf32>
    %c0_29 = arith.constant 0 : index
    %c8_30 = arith.constant 8 : index
    %c0_31 = arith.constant 0 : index
    %26 = vector.load %arg20[%c0_29, %c8_30, %c0_31] : memref<2x24x128xf32, #tpu.memory_space<vmem>>, vector<2x16x64xf32>
    %27 = vector.shape_cast %26 : vector<2x16x64xf32> to vector<32x64xf32>
    %28 = tpu.concatenate %23, %25, %27 in 1 : vector<32x64xf32>, vector<32x64xf32>, vector<32x64xf32> -> vector<32x192xf32>
    %c0_32 = arith.constant 0 : index
    %c0_33 = arith.constant 0 : index
    %29 = vector.load %arg3[%c0_32, %c0_33] : memref<192x64xf32, #tpu.memory_space<vmem>>, vector<192x64xf32>
    %cst_34 = arith.constant dense<0.000000e+00> : vector<32x64xf32>
    %30 = tpu.matmul %28, %29, %cst_34 {dimension_numbers = #tpu.dot_dimension_numbers<[1], [0], [0], [1], [0, 0, 1, 1], [], []>} : vector<32x192xf32>, vector<192x64xf32>, vector<32x64xf32> -> vector<32x64xf32>
    %c0_35 = arith.constant 0 : index
    %c0_36 = arith.constant 0 : index
    %31 = vector.load %arg4[%c0_35, %c0_36] : memref<1x64xf32, #tpu.memory_space<vmem>>, vector<1x64xf32>
    %32 = vector.broadcast %31 : vector<1x64xf32> to vector<32x64xf32>
    %33 = arith.addf %30, %32 : vector<32x64xf32>
    %cst_37 = arith.constant 0.000000e+00 : f32
    %34 = vector.broadcast %cst_37 : f32 to vector<32x64xf32>
    %35 = arith.maximumf %33, %34 : vector<32x64xf32>
    %c0_38 = arith.constant 0 : index
    %c0_39 = arith.constant 0 : index
    %36 = vector.load %arg5[%c0_38, %c0_39] : memref<8x64xf32, #tpu.memory_space<vmem>>, vector<8x64xf32>
    %cst_40 = arith.constant dense<0.000000e+00> : vector<32x64xf32>
    %37 = tpu.matmul %3, %36, %cst_40 {dimension_numbers = #tpu.dot_dimension_numbers<[1], [0], [0], [1], [0, 0, 1, 1], [], []>} : vector<32x8xf32>, vector<8x64xf32>, vector<32x64xf32> -> vector<32x64xf32>
    %c0_41 = arith.constant 0 : index
    %c0_42 = arith.constant 0 : index
    %38 = vector.load %arg6[%c0_41, %c0_42] : memref<1x64xf32, #tpu.memory_space<vmem>>, vector<1x64xf32>
    %39 = vector.broadcast %38 : vector<1x64xf32> to vector<32x64xf32>
    %40 = arith.addf %37, %39 : vector<32x64xf32>
    %41 = arith.addf %35, %40 : vector<32x64xf32>
    %cst_43 = arith.constant 0.000000e+00 : f32
    %42 = vector.broadcast %cst_43 : f32 to vector<32x64xf32>
    %43 = arith.maximumf %41, %42 : vector<32x64xf32>
    %44 = vector.shape_cast %43 : vector<32x64xf32> to vector<2x16x64xf32>
    %c0_44 = arith.constant 0 : index
    %c8_45 = arith.constant 8 : index
    %c0_46 = arith.constant 0 : index
    %45 = vector.load %arg20[%c0_44, %c8_45, %c0_46] : memref<2x24x128xf32, #tpu.memory_space<vmem>>, vector<2x16x64xf32>
    tpu.vector_store %arg20[%c0_44, %c8_45, %c0_46], %44 {strides = array<i32>} : memref<2x24x128xf32, #tpu.memory_space<vmem>>, vector<2x16x64xf32>,
    %c0_47 = arith.constant 0 : index
    %c4 = arith.constant 4 : index
    %c0_48 = arith.constant 0 : index
    %46 = vector.load %arg20[%c0_47, %c4, %c0_48] : memref<2x24x128xf32, #tpu.memory_space<vmem>>, vector<2x16x64xf32>
    %47 = vector.shape_cast %46 : vector<2x16x64xf32> to vector<32x64xf32>
    %c0_49 = arith.constant 0 : index
    %c6_50 = arith.constant 6 : index
    %c0_51 = arith.constant 0 : index
    %48 = vector.load %arg20[%c0_49, %c6_50, %c0_51] : memref<2x24x128xf32, #tpu.memory_space<vmem>>, vector<2x16x64xf32>
    %49 = vector.shape_cast %48 : vector<2x16x64xf32> to vector<32x64xf32>
    %c0_52 = arith.constant 0 : index
    %c8_53 = arith.constant 8 : index
    %c0_54 = arith.constant 0 : index
    %50 = vector.load %arg20[%c0_52, %c8_53, %c0_54] : memref<2x24x128xf32, #tpu.memory_space<vmem>>, vector<2x16x64xf32>
    %51 = vector.shape_cast %50 : vector<2x16x64xf32> to vector<32x64xf32>
    %52 = tpu.concatenate %47, %49, %51 in 1 : vector<32x64xf32>, vector<32x64xf32>, vector<32x64xf32> -> vector<32x192xf32>
    %c0_55 = arith.constant 0 : index
    %c0_56 = arith.constant 0 : index
    %53 = vector.load %arg7[%c0_55, %c0_56] : memref<192x128xf32, #tpu.memory_space<vmem>>, vector<192x128xf32>
    %cst_57 = arith.constant dense<0.000000e+00> : vector<32x128xf32>
    %54 = tpu.matmul %52, %53, %cst_57 {dimension_numbers = #tpu.dot_dimension_numbers<[1], [0], [0], [1], [0, 0, 1, 1], [], []>} : vector<32x192xf32>, vector<192x128xf32>, vector<32x128xf32> -> vector<32x128xf32>
    %c0_58 = arith.constant 0 : index
    %c0_59 = arith.constant 0 : index
    %55 = vector.load %arg8[%c0_58, %c0_59] : memref<1x128xf32, #tpu.memory_space<vmem>>, vector<1x128xf32>
    %56 = vector.broadcast %55 : vector<1x128xf32> to vector<32x128xf32>
    %57 = arith.addf %54, %56 : vector<32x128xf32>
    %cst_60 = arith.constant 0.000000e+00 : f32
    %58 = vector.broadcast %cst_60 : f32 to vector<32x128xf32>
    %59 = arith.maximumf %57, %58 : vector<32x128xf32>
    %60 = vector.shape_cast %59 : vector<32x128xf32> to vector<2x16x128xf32>
    %c0_61 = arith.constant 0 : index
    %c8_62 = arith.constant 8 : index
    %c0_63 = arith.constant 0 : index
    %61 = vector.load %arg20[%c0_61, %c8_62, %c0_63] : memref<2x24x128xf32, #tpu.memory_space<vmem>>, vector<2x16x128xf32>
    tpu.vector_store %arg20[%c0_61, %c8_62, %c0_63], %60 {strides = array<i32>} : memref<2x24x128xf32, #tpu.memory_space<vmem>>, vector<2x16x128xf32>,
    %c0_64 = arith.constant 0 : index
    %c4_65 = arith.constant 4 : index
    %c0_66 = arith.constant 0 : index
    %62 = vector.load %arg20[%c0_64, %c4_65, %c0_66] : memref<2x24x128xf32, #tpu.memory_space<vmem>>, vector<2x16x128xf32>
    %63 = vector.shape_cast %62 : vector<2x16x128xf32> to vector<32x128xf32>
    %c0_67 = arith.constant 0 : index
    %c6_68 = arith.constant 6 : index
    %c0_69 = arith.constant 0 : index
    %64 = vector.load %arg20[%c0_67, %c6_68, %c0_69] : memref<2x24x128xf32, #tpu.memory_space<vmem>>, vector<2x16x128xf32>
    %65 = vector.shape_cast %64 : vector<2x16x128xf32> to vector<32x128xf32>
    %c0_70 = arith.constant 0 : index
    %c8_71 = arith.constant 8 : index
    %c0_72 = arith.constant 0 : index
    %66 = vector.load %arg20[%c0_70, %c8_71, %c0_72] : memref<2x24x128xf32, #tpu.memory_space<vmem>>, vector<2x16x128xf32>
    %67 = vector.shape_cast %66 : vector<2x16x128xf32> to vector<32x128xf32>
    %68 = tpu.concatenate %63, %65, %67 in 1 : vector<32x128xf32>, vector<32x128xf32>, vector<32x128xf32> -> vector<32x384xf32>
    %c0_73 = arith.constant 0 : index
    %c0_74 = arith.constant 0 : index
    %69 = vector.load %arg9[%c0_73, %c0_74] : memref<384x128xf32, #tpu.memory_space<vmem>>, vector<384x128xf32>
    %cst_75 = arith.constant dense<0.000000e+00> : vector<32x128xf32>
    %70 = tpu.matmul %68, %69, %cst_75 {dimension_numbers = #tpu.dot_dimension_numbers<[1], [0], [0], [1], [0, 0, 1, 1], [], []>} : vector<32x384xf32>, vector<384x128xf32>, vector<32x128xf32> -> vector<32x128xf32>
    %c0_76 = arith.constant 0 : index
    %c0_77 = arith.constant 0 : index
    %71 = vector.load %arg10[%c0_76, %c0_77] : memref<1x128xf32, #tpu.memory_space<vmem>>, vector<1x128xf32>
    %72 = vector.broadcast %71 : vector<1x128xf32> to vector<32x128xf32>
    %73 = arith.addf %70, %72 : vector<32x128xf32>
    %cst_78 = arith.constant 0.000000e+00 : f32
    %74 = vector.broadcast %cst_78 : f32 to vector<32x128xf32>
    %75 = arith.maximumf %73, %74 : vector<32x128xf32>
    %c0_79 = arith.constant 0 : index
    %c0_80 = arith.constant 0 : index
    %76 = vector.load %arg11[%c0_79, %c0_80] : memref<64x128xf32, #tpu.memory_space<vmem>>, vector<64x128xf32>
    %cst_81 = arith.constant dense<0.000000e+00> : vector<32x128xf32>
    %77 = tpu.matmul %43, %76, %cst_81 {dimension_numbers = #tpu.dot_dimension_numbers<[1], [0], [0], [1], [0, 0, 1, 1], [], []>} : vector<32x64xf32>, vector<64x128xf32>, vector<32x128xf32> -> vector<32x128xf32>
    %c0_82 = arith.constant 0 : index
    %c0_83 = arith.constant 0 : index
    %78 = vector.load %arg12[%c0_82, %c0_83] : memref<1x128xf32, #tpu.memory_space<vmem>>, vector<1x128xf32>
    %79 = vector.broadcast %78 : vector<1x128xf32> to vector<32x128xf32>
    %80 = arith.addf %77, %79 : vector<32x128xf32>
    %81 = arith.addf %75, %80 : vector<32x128xf32>
    %cst_84 = arith.constant 0.000000e+00 : f32
    %82 = vector.broadcast %cst_84 : f32 to vector<32x128xf32>
    %83 = arith.maximumf %81, %82 : vector<32x128xf32>
    %84 = vector.shape_cast %83 : vector<32x128xf32> to vector<2x16x128xf32>
    %cst_85 = arith.constant dense<0.000000e+00> : vector<2x16xf32>
    %85 = vector.multi_reduction <add>, %84, %cst_85 [2] : vector<2x16x128xf32> to vector<2x16xf32>
    %86 = vector.shape_cast %85 : vector<2x16xf32> to vector<2x16x1xf32>
    %cst_86 = arith.constant 1.280000e+02 : f32
    %87 = vector.broadcast %cst_86 : f32 to vector<2x16x1xf32>
    %88 = arith.divf %86, %87 : vector<2x16x1xf32>
    %cst_87 = arith.constant dense<0xFF800000> : vector<2x1xf32>
    %89 = vector.multi_reduction <maximumf>, %88, %cst_87 [1] : vector<2x16x1xf32> to vector<2x1xf32>
    %90 = vector.shape_cast %89 : vector<2x1xf32> to vector<2x1x1xf32>
    %91 = vector.broadcast %90 : vector<2x1x1xf32> to vector<2x16x1xf32>
    %92 = arith.subf %88, %91 : vector<2x16x1xf32>
    %93 = math.exp %92 : vector<2x16x1xf32>
    %cst_88 = arith.constant dense<0.000000e+00> : vector<2x1xf32>
    %94 = vector.multi_reduction <add>, %93, %cst_88 [1] : vector<2x16x1xf32> to vector<2x1xf32>
    %95 = vector.shape_cast %94 : vector<2x1xf32> to vector<2x1x1xf32>
    %96 = vector.broadcast %95 : vector<2x1x1xf32> to vector<2x16x1xf32>
    %97 = arith.divf %93, %96 : vector<2x16x1xf32>
    %98 = vector.broadcast %97 : vector<2x16x1xf32> to vector<2x16x128xf32>
    %99 = arith.mulf %98, %84 : vector<2x16x128xf32>
    %cst_89 = arith.constant dense<0.000000e+00> : vector<2x128xf32>
    %100 = vector.multi_reduction <add>, %99, %cst_89 [1] : vector<2x16x128xf32> to vector<2x128xf32>
    %cst_90 = arith.constant dense<0.000000e+00> : vector<2xf32>
    %101 = vector.multi_reduction <add>, %100, %cst_90 [1] : vector<2x128xf32> to vector<2xf32>
    %102 = vector.shape_cast %101 : vector<2xf32> to vector<2x1xf32>
    %cst_91 = arith.constant 1.280000e+02 : f32
    %103 = vector.broadcast %cst_91 : f32 to vector<2x1xf32>
    %104 = arith.divf %102, %103 : vector<2x1xf32>
    %105 = vector.broadcast %104 : vector<2x1xf32> to vector<2x128xf32>
    %106 = arith.subf %100, %105 : vector<2x128xf32>
    %107 = arith.mulf %106, %106 : vector<2x128xf32>
    %cst_92 = arith.constant dense<0.000000e+00> : vector<2xf32>
    %108 = vector.multi_reduction <add>, %107, %cst_92 [1] : vector<2x128xf32> to vector<2xf32>
    %109 = vector.shape_cast %108 : vector<2xf32> to vector<2x1xf32>
    %cst_93 = arith.constant 1.280000e+02 : f32
    %110 = vector.broadcast %cst_93 : f32 to vector<2x1xf32>
    %111 = arith.divf %109, %110 : vector<2x1xf32>
    %112 = vector.broadcast %104 : vector<2x1xf32> to vector<2x128xf32>
    %113 = arith.subf %100, %112 : vector<2x128xf32>
    %cst_94 = arith.constant 9.99999974E-6 : f32
    %114 = vector.broadcast %cst_94 : f32 to vector<2x1xf32>
    %115 = arith.addf %111, %114 : vector<2x1xf32>
    %116 = math.rsqrt %115 : vector<2x1xf32>
    %117 = vector.broadcast %116 : vector<2x1xf32> to vector<2x128xf32>
    %118 = arith.mulf %113, %117 : vector<2x128xf32>
    %c0_95 = arith.constant 0 : index
    %c0_96 = arith.constant 0 : index
    %119 = vector.load %arg13[%c0_95, %c0_96] : memref<1x128xf32, #tpu.memory_space<vmem>>, vector<1x128xf32>
    %120 = vector.broadcast %119 : vector<1x128xf32> to vector<2x128xf32>
    %121 = arith.mulf %118, %120 : vector<2x128xf32>
    %c0_97 = arith.constant 0 : index
    %c0_98 = arith.constant 0 : index
    %122 = vector.load %arg14[%c0_97, %c0_98] : memref<1x128xf32, #tpu.memory_space<vmem>>, vector<1x128xf32>
    %123 = vector.broadcast %122 : vector<1x128xf32> to vector<2x128xf32>
    %124 = arith.addf %121, %123 : vector<2x128xf32>
    %c0_99 = arith.constant 0 : index
    %c0_100 = arith.constant 0 : index
    %125 = vector.load %arg15[%c0_99, %c0_100] : memref<128x128xf32, #tpu.memory_space<vmem>>, vector<128x128xf32>
    %cst_101 = arith.constant dense<0.000000e+00> : vector<2x128xf32>
    %126 = tpu.matmul %124, %125, %cst_101 {dimension_numbers = #tpu.dot_dimension_numbers<[1], [0], [0], [1], [0, 0, 1, 1], [], []>} : vector<2x128xf32>, vector<128x128xf32>, vector<2x128xf32> -> vector<2x128xf32>
    %c0_102 = arith.constant 0 : index
    %c0_103 = arith.constant 0 : index
    %127 = vector.load %arg16[%c0_102, %c0_103] : memref<1x128xf32, #tpu.memory_space<vmem>>, vector<1x128xf32>
    %128 = vector.broadcast %127 : vector<1x128xf32> to vector<2x128xf32>
    %129 = arith.addf %126, %128 : vector<2x128xf32>
    %cst_104 = arith.constant 0.000000e+00 : f32
    %130 = vector.broadcast %cst_104 : f32 to vector<2x128xf32>
    %131 = arith.maximumf %129, %130 : vector<2x128xf32>
    %c0_105 = arith.constant 0 : index
    %c0_106 = arith.constant 0 : index
    %132 = vector.load %arg17[%c0_105, %c0_106] : memref<128x10xf32, #tpu.memory_space<vmem>>, vector<128x10xf32>
    %cst_107 = arith.constant dense<0.000000e+00> : vector<2x10xf32>
    %133 = tpu.matmul %131, %132, %cst_107 {dimension_numbers = #tpu.dot_dimension_numbers<[1], [0], [0], [1], [0, 0, 1, 1], [], []>} : vector<2x128xf32>, vector<128x10xf32>, vector<2x10xf32> -> vector<2x10xf32>
    %c0_108 = arith.constant 0 : index
    %c0_109 = arith.constant 0 : index
    %134 = vector.load %arg18[%c0_108, %c0_109] : memref<1x10xf32, #tpu.memory_space<vmem>>, vector<1x10xf32>
    %135 = vector.broadcast %134 : vector<1x10xf32> to vector<2x10xf32>
    %136 = arith.addf %133, %135 : vector<2x10xf32>
    %c0_110 = arith.constant 0 : index
    %c0_111 = arith.constant 0 : index
    %137 = vector.load %arg19[%c0_110, %c0_111] : memref<2x10xf32, #tpu.memory_space<vmem>>, vector<2x10xf32>
    tpu.vector_store %arg19[%c0_110, %c0_111], %136 {strides = array<i32>} : memref<2x10xf32, #tpu.memory_space<vmem>>, vector<2x10xf32>,
    return
  }
}

</mosaic_0001>

<bundles_post_ra>
// kernel: tpu_custom_call.1
= control target key start
LH: loop header
LB: loop body
LE: loop exit
PB: predicated region body
PF: predicated region fallthrough
CT: control target
= control target key end

     0   :  { %s2973_s0 = inlined_call_operand.vmem [shape: f32[2,16,8], index: 0, kind: input, shape index: {}]   ;;  %s2974_s1 = inlined_call_operand.vmem [shape: f32[24,64], index: 1, kind: input, shape index: {}]   ;;  %s2975_s2 = inlined_call_operand.vmem [shape: f32[1,64], index: 2, kind: input, shape index: {}]   ;;  %s2976_s3 = inlined_call_operand.vmem [shape: f32[192,64], index: 3, kind: input, shape index: {}]   ;;  %s2977_s4 = inlined_call_operand.hbm [shape: f32[1,64], index: 4, kind: input, shape index: {}]   ;;  %s2978_s5 = inlined_call_operand.hbm [shape: f32[8,64], index: 5, kind: input, shape index: {}]   ;;  %s2979_s6 = inlined_call_operand.hbm [shape: f32[1,64], index: 6, kind: input, shape index: {}]   ;;  %s2980_s7 = inlined_call_operand.hbm [shape: f32[192,128], index: 7, kind: input, shape index: {}]   ;;  %s2981_s8 = inlined_call_operand.hbm [shape: f32[1,128], index: 8, kind: input, shape index: {}]   ;;  %s2982_s9 = inlined_call_operand.vmem [shape: f32[384,128], index: 9, kind: input, shape index: {}]   ;;  %s2983_s10 = inlined_call_operand.hbm [shape: f32[1,128], index: 10, kind: input, shape index: {}]   ;;  %s2984_s11 = inlined_call_operand.hbm [shape: f32[64,128], index: 11, kind: input, shape index: {}]   ;;  %s2985_s12 = inlined_call_operand.vmem [shape: f32[1,128], index: 12, kind: input, shape index: {}]   ;;  %s2986_s13 = inlined_call_operand.vmem [shape: f32[1,128], index: 13, kind: input, shape index: {}]   ;;  %s2987_s14 = inlined_call_operand.vmem [shape: f32[1,128], index: 14, kind: input, shape index: {}]   ;;  %s2988_s15 = inlined_call_operand.vmem [shape: f32[128,128], index: 15, kind: input, shape index: {}]   ;;  %s2989_s16 = inlined_call_operand.vmem [shape: f32[1,128], index: 16, kind: input, shape index: {}]   ;;  %s2990_s17 = inlined_call_operand.vmem [shape: f32[128,10], index: 17, kind: input, shape index: {}]   ;;  %s2991_s18 = inlined_call_operand.vmem [shape: f32[1,10], index: 18, kind: input, shape index: {}]   ;;  %s2992_s19 = inlined_call_operand.hbm [shape: f32[2,10], index: 19, kind: output, shape index: {}]  }
   0x1   :  { %2996 = sst [smem:[#allocation21_spill]] %s2973_s0 }
   0x2   :  { %2997 = sst [smem:[#allocation22_spill]] %s2974_s1 }
   0x3   :  { %2998 = sst [smem:[#allocation23_spill]] %s2975_s2 }
   0x4   :  { %2999 = sst [smem:[#allocation24_spill]] %s2976_s3 }
   0x5   :  { %24 = vsyncpa [#allocation4], 0 }
   0x6   :  { %25 = vsyncpa [#allocation7], 0 }
   0x7   :  { %26 = vsyncpa [#allocation10], 0 }
   0x8   :  { %27 = vsyncpa [#allocation13], 0 }
   0x9   :  { %28 = vsyncpa [#allocation5], 0  ;;  %s2203_s0 = smov [#allocation6]   ;;  %s2204_s20 = smov [#allocation9]  }
   0xa   :  { %s53_s30 = sshll.u32 %s2203_s0, 4  ;;  %s72_s21 = sshll.u32 %s2204_s20, 4  ;;  %s54_s30 = int_to_ptr.vmem [resolvable:$true] %s53_s30  ;;  %s2318_s21 = int_to_ptr.vmem [resolvable:$true] %s72_s21 }
   0xb   :  { %s2017_s2 = scalar_lea.hbm %s2978_s5, 128 }
   0xc   :  { %p2018_p0 = scmp.ne.s32.totalorder %s2978_s5, %s2017_s2  ;;  %p2021_p1 = scmp.lt.u32.totalorder %s2017_s2, %s2978_s5 }
   0xe   :  { %p2023_p2 = pnand %p2021_p1, %p2018_p0 }
  0x10   :  { %2026 = shalt.err (!%p2023_p2)
}
  0x11   :  { %s2027_s26 = scalar_lea.vmem %s54_s30, 128  ;;  %p2032_p4 = scmp.lt.s32.totalorder %s54_s30, %s54_s30 }
  0x12   :  { %p2028_p3 = scmp.ne.s32.totalorder %s54_s30, %s2027_s26  ;;  %p2033_p5 = scmp.lt.s32.totalorder %s2027_s26, %s2027_s26 }
  0x14   :  { %p2034_p6 = por %p2033_p5, %p2032_p4 }
  0x16   :  { %p2035_p7 = pnand %p2034_p6, %p2028_p3 }
  0x18   :  { %2038 = shalt.err (!%p2035_p7)
}
  0x19   :  { %56 = dma.hbm_to_vmem [thread:$0]  %s2978_s5, 128, %s54_s30, [#allocation7]  }
  0x1a   :  { %s2039_s20 = scalar_lea.hbm %s2980_s7, 3072 }
  0x1b   :  { %p2040_p8 = scmp.ne.s32.totalorder %s2980_s7, %s2039_s20  ;;  %p2043_p9 = scmp.lt.u32.totalorder %s2039_s20, %s2980_s7 }
  0x1d   :  { %p2045_p10 = pnand %p2043_p9, %p2040_p8 }
  0x1f   :  { %2048 = shalt.err (!%p2045_p10)
}
  0x20   :  { %s2049_s24 = scalar_lea.vmem %s2318_s21, 3072  ;;  %p2054_p12 = scmp.lt.s32.totalorder %s2318_s21, %s2318_s21 }
  0x21   :  { %p2050_p11 = scmp.ne.s32.totalorder %s2318_s21, %s2049_s24  ;;  %p2055_p13 = scmp.lt.s32.totalorder %s2049_s24, %s2049_s24 }
  0x23   :  { %p2056_p0 = por %p2055_p13, %p2054_p12 }
  0x25   :  { %p2057_p1 = pnand %p2056_p0, %p2050_p11 }
  0x27   :  { %2060 = shalt.err (!%p2057_p1)
}
  0x28   :  { %s2205_s5 = smov 128   ;;  %s2206_s30 = smov 8  }
  0x29   :  { %78 = dma.hbm_to_vmem [thread:$0]  %s2980_s7, 3072, %s2318_s21, [#allocation10], %s2205_s5, %s2205_s5, %s2206_s30  }
  0x2a   :  { %s2207_s26 = smov [#allocation12]   ;;  %s2208_s28 = smov [#allocation3]  }
  0x2b   :  { %s97_s27 = sshll.u32 %s2207_s26, 4  ;;  %s43_s29 = sshll.u32 %s2208_s28, 4  ;;  %s98_s27 = int_to_ptr.vmem [resolvable:$true] %s97_s27  ;;  %s44_s29 = int_to_ptr.vmem [resolvable:$true] %s43_s29 }
  0x2c   :  { %s2061_s1 = scalar_lea.hbm %s2983_s10, 16 }
  0x2d   :  { %p2062_p2 = scmp.ne.s32.totalorder %s2983_s10, %s2061_s1  ;;  %p2065_p3 = scmp.lt.u32.totalorder %s2061_s1, %s2983_s10 }
  0x2f   :  { %p2067_p4 = pnand %p2065_p3, %p2062_p2 }
  0x31   :  { %2070 = shalt.err (!%p2067_p4)
}
  0x32   :  { %s2071_s7 = scalar_lea.vmem %s98_s27, 16  ;;  %s2075_s21 = scalar_lea.vmem %s98_s27, 32 }
  0x33   :  { %p2072_p5 = scmp.ne.s32.totalorder %s98_s27, %s2071_s7  ;;  %p2076_p6 = scmp.lt.s32.totalorder %s98_s27, %s98_s27 }
  0x34   :  { %p2077_p7 = scmp.lt.s32.totalorder %s2075_s21, %s2071_s7 }
  0x36   :  { %p2078_p8 = por %p2077_p7, %p2076_p6 }
  0x38   :  { %p2079_p9 = pnand %p2078_p8, %p2072_p5 }
  0x3a   :  { %2082 = shalt.err (!%p2079_p9)
}
  0x3b   :  { %100 = dma.hbm_to_vmem [thread:$0]  %s2983_s10, 16, %s98_s27, [#allocation13]  }
  0x3c   :  { %s2083_s0 = scalar_lea.hbm %s2977_s4, 16 }
  0x3d   :  { %p2084_p10 = scmp.ne.s32.totalorder %s2977_s4, %s2083_s0  ;;  %p2087_p11 = scmp.lt.u32.totalorder %s2083_s0, %s2977_s4 }
  0x3f   :  { %p2089_p12 = pnand %p2087_p11, %p2084_p10 }
  0x41   :  { %2092 = shalt.err (!%p2089_p12)
}
  0x42   :  { %s2093_s23 = scalar_lea.vmem %s44_s29, 16  ;;  %s2097_s24 = scalar_lea.vmem %s44_s29, 32 }
  0x43   :  { %p2094_p13 = scmp.ne.s32.totalorder %s44_s29, %s2093_s23  ;;  %p2098_p0 = scmp.lt.s32.totalorder %s44_s29, %s44_s29 }
  0x44   :  { %p2099_p1 = scmp.lt.s32.totalorder %s2097_s24, %s2093_s23 }
  0x46   :  { %p2100_p2 = por %p2099_p1, %p2098_p0 }
  0x48   :  { %p2101_p3 = pnand %p2100_p2, %p2094_p13 }
  0x4a   :  { %2104 = shalt.err (!%p2101_p3)
}
  0x4b   :  { %46 = dma.hbm_to_vmem [thread:$0]  %s2977_s4, 16, %s44_s29, [#allocation4]  }
  0x4c   :  { %s2209_s7 = smov [#allocation8]   ;;  %s2210_s25 = smov [#allocation11]  }
  0x4d   :  { %s63_s21 = sshll.u32 %s2209_s7, 4  ;;  %s85_s3 = sshll.u32 %s2210_s25, 4  ;;  %s64_s21 = int_to_ptr.vmem [resolvable:$true] %s63_s21  ;;  %s86_s3 = int_to_ptr.vmem [resolvable:$true] %s85_s3 }
  0x4e   :  { %s2105_s0 = scalar_lea.hbm %s2979_s6, 16 }
  0x4f   :  { %p2106_p4 = scmp.ne.s32.totalorder %s2979_s6, %s2105_s0  ;;  %p2109_p5 = scmp.lt.u32.totalorder %s2105_s0, %s2979_s6 }
  0x51   :  { %p2111_p6 = pnand %p2109_p5, %p2106_p4 }
  0x53   :  { %2114 = shalt.err (!%p2111_p6)
}
  0x54   :  { %s2115_s4 = scalar_lea.vmem %s64_s21, 16  ;;  %s2119_s29 = scalar_lea.vmem %s64_s21, 32 }
  0x55   :  { %p2116_p7 = scmp.ne.s32.totalorder %s64_s21, %s2115_s4  ;;  %p2120_p8 = scmp.lt.s32.totalorder %s64_s21, %s64_s21 }
  0x56   :  { %p2121_p9 = scmp.lt.s32.totalorder %s2119_s29, %s2115_s4 }
  0x58   :  { %p2122_p10 = por %p2121_p9, %p2120_p8 }
  0x5a   :  { %p2123_p11 = pnand %p2122_p10, %p2116_p7 }
  0x5c   :  { %2126 = shalt.err (!%p2123_p11)
}
  0x5d   :  { %66 = dma.hbm_to_vmem [thread:$0]  %s2979_s6, 16, %s64_s21, [#allocation7]  }
  0x5e   :  { %s2127_s7 = scalar_lea.hbm %s2981_s8, 16 }
  0x5f   :  { %p2128_p12 = scmp.ne.s32.totalorder %s2981_s8, %s2127_s7  ;;  %p2131_p13 = scmp.lt.u32.totalorder %s2127_s7, %s2981_s8 }
  0x61   :  { %p2133_p0 = pnand %p2131_p13, %p2128_p12 }
  0x63   :  { %2136 = shalt.err (!%p2133_p0)
}
  0x64   :  { %s2137_s20 = scalar_lea.vmem %s86_s3, 16  ;;  %s2141_s1 = scalar_lea.vmem %s86_s3, 32 }
  0x65   :  { %p2138_p1 = scmp.ne.s32.totalorder %s86_s3, %s2137_s20  ;;  %p2142_p2 = scmp.lt.s32.totalorder %s86_s3, %s86_s3 }
  0x66   :  { %p2143_p3 = scmp.lt.s32.totalorder %s2141_s1, %s2137_s20 }
  0x68   :  { %p2144_p4 = por %p2143_p3, %p2142_p2 }
  0x6a   :  { %p2145_p5 = pnand %p2144_p4, %p2138_p1 }
  0x6c   :  { %2148 = shalt.err (!%p2145_p5)
}
  0x6d   :  { %88 = dma.hbm_to_vmem [thread:$0]  %s2981_s8, 16, %s86_s3, [#allocation10]  }
  0x6e   :  { %s2211_s22 = smov [#allocation14]   ;;  %s2149_s23 = scalar_lea.hbm %s2984_s11, 1024 }
  0x6f   :  { %s106_s2 = sshll.u32 %s2211_s22, 4  ;;  %p2150_p6 = scmp.ne.s32.totalorder %s2984_s11, %s2149_s23  ;;  %s107_s2 = int_to_ptr.vmem [resolvable:$true] %s106_s2 }
  0x70   :  { %p2153_p7 = scmp.lt.u32.totalorder %s2149_s23, %s2984_s11 }
  0x72   :  { %p2155_p8 = pnand %p2153_p7, %p2150_p6 }
  0x74   :  { %2158 = shalt.err (!%p2155_p8)
}
  0x75   :  { %s2159_s25 = scalar_lea.vmem %s107_s2, 1024  ;;  %p2164_p10 = scmp.lt.s32.totalorder %s107_s2, %s107_s2 }
  0x76   :  { %p2160_p9 = scmp.ne.s32.totalorder %s107_s2, %s2159_s25  ;;  %p2165_p11 = scmp.lt.s32.totalorder %s2159_s25, %s2159_s25 }
  0x78   :  { %p2166_p12 = por %p2165_p11, %p2164_p10 }
  0x7a   :  { %p2167_p13 = pnand %p2166_p12, %p2160_p9 }
  0x7c   :  { %2170 = shalt.err (!%p2167_p13)
}
  0x7d   :  { %112 = dma.hbm_to_vmem [thread:$0]  %s2984_s11, 1024, %s107_s2, [#allocation13], %s2205_s5, %s2205_s5, %s2206_s30  }
  0x7e   :  { %2193 = dma.done.wait [#allocation4], 16  }
  0x7f   :  { %2194 = vsyncadd [#allocation4], 4294967280 }
  0x80   :  { %2195 = dma.done.wait [#allocation7], 144  }
  0x81   :  { %2196 = vsyncadd [#allocation7], 4294967152 }
  0x82   :  { %2197 = dma.done.wait [#allocation10], 3088  }
  0x83   :  { %2198 = vsyncadd [#allocation10], 4294964208 }
  0x84   :  { %2199 = dma.done.wait [#allocation13], 1040  }
  0x85   :  { %2200 = vsyncadd [#allocation13], 4294966256  ;;  %v2212_v0 = vmov 0.0   ;;  %vm154_vm0 = vcmask 64512   ;;  %s3000_s0 = sld [smem:[#allocation21_spill]]  ;;  %s3001_s4 = sld [smem:[#allocation22_spill]] }
  0x86   :  { %148 = vst [vmem:[#allocation2] sm:$0xff] %v2212_v0  ;;  %149 = vst [vmem:[#allocation2 + $0x18] sm:$0xff] %v2212_v0  ;;  %s2213_s27 = smov 16   ;;  %vm207_vm1 = vcmask 130048   ;;  %vm222_vm2 = vcmask 195584   ;;  %s3002_s25 = sld [smem:[#allocation24_spill]] }
  0x87   :  { %v2214_v40 = vmov 0.0|0.0   ;;  %v493_v46 = vld [vmem:[#allocation6] sm:$0xff]  ;;  %s3003_s1 = sld [smem:[#allocation23_spill]]  ;;  %vm324_vm3 = vcmask 523264   ;;  %vm1218_vm4 = vcmask 1041409   ;;  %vm1221_vm5 = vcmask 1041408  }
  0x88   :  { %1787 = vmatprep.subr.bf16.mxu1 %v2214_v40  ;;  %vm2216_vm6 = vmmov 0   ;;  %s2217_s29 = smov [#allocation15]   ;;  %vm1461_vm7 = vcmask 74752  }
  0x89   :  { %s1469_s23 = sshll.u32 %s2217_s29, 4  ;;  %s1470_s23 = int_to_ptr.vmem [resolvable:$true] %s1469_s23 }
  0x8a   :  { %p2176_p1 = scmp.lt.s32.totalorder %s1470_s23, %s1470_s23 }
  0x8b   :  { %v150_v1 = vld [vmem:[%s3000_s0] sm:$0xff]  ;;  %v2421_v2 = vld [vmem:[%s3000_s0 + $0x8] sm:$0xff]  ;;  %v2426_v3 = vld [vmem:[%s3000_s0 + $0x10] sm:$0xff] }
  0x8c   :  { %155 = vst.msk [vmem:[#allocation2 + $0x8] sm:$0xff] %vm154_vm0, %v150_v1  ;;  %156 = vst.msk [vmem:[#allocation2 + $0x10] sm:$0xff] %vm154_vm0, %v2421_v2  ;;  %v2434_v4 = vld [vmem:[%s3000_s0 + $0x18] sm:$0xff]  ;;  %v212_v5 = vld [vmem:[%s3001_s4] sm:$0xff] }
  0x8d   :  { %157 = vst.msk [vmem:[#allocation2 + $0x20] sm:$0xff] %vm154_vm0, %v2426_v3  ;;  %v213_v6 = vld [vmem:[%s3001_s4 + $0x8] sm:$0xff]  ;;  %158 = vst.msk [vmem:[#allocation2 + $0x28] sm:$0xff] %vm154_vm0, %v2434_v4  ;;  %v214_v8 = vld [vmem:[%s3001_s4 + $0x10] sm:$0xff] }
  0x8e   :  { %v1783_v7 = vpack.c.bf16 %v213_v6, %v212_v5  ;;  %v361_v37 = vld [vmem:[%s3002_s25] sm:$0xff]  ;;  %v362_v38 = vld [vmem:[%s3002_s25 + $0x8] sm:$0xff]  ;;  %v363_v39 = vld [vmem:[%s3002_s25 + $0x10] sm:$0xff] }
  0x8f   :  { %v1788_v41 = vpack.c.bf16 %v362_v38, %v361_v37  ;;  %v364_v42 = vld [vmem:[%s3002_s25 + $0x18] sm:$0xff]  ;;  %v365_v44 = vld [vmem:[%s3002_s25 + $0x20] sm:$0xff]  ;;  %v366_v45 = vld [vmem:[%s3002_s25 + $0x28] sm:$0xff] }
  0x90   :  { %1784 = vmatprep.subr.bf16.mxu0 %v1783_v7  ;;  %v1791_v43 = vpack.c.bf16 %v364_v42, %v363_v39  ;;  %v1794_v47 = vpack.c.bf16 %v366_v45, %v365_v44  ;;  %v367_v48 = vld [vmem:[%s3002_s25 + $0x30] sm:$0xff]  ;;  %v368_v49 = vld [vmem:[%s3002_s25 + $0x38] sm:$0xff]  ;;  %v369_v51 = vld [vmem:[%s3002_s25 + $0x40] sm:$0xff] }
  0x91   :  { %1786 = vmatpush3.bf16.msra.mxu0 %v1783_v7  ;;  %1789 = vmatpush1.bf16.msra.mxu1 %v1788_v41  ;;  %v1797_v50 = vpack.c.bf16 %v368_v49, %v367_v48  ;;  %v370_v52 = vld [vmem:[%s3002_s25 + $0x48] sm:$0xff]  ;;  %v371_v54 = vld [vmem:[%s3002_s25 + $0x50] sm:$0xff]  ;;  %v372_v55 = vld [vmem:[%s3002_s25 + $0x58] sm:$0xff] }
  0x92   :  { %1637 = vmatprep.subr.mxu0 %v214_v8  ;;  %1790 = vmatprep.subr.bf16.mxu1 %v2214_v40  ;;  %v1800_v53 = vpack.c.bf16 %v370_v52, %v369_v51  ;;  %v1803_v56 = vpack.c.bf16 %v372_v55, %v371_v54  ;;  %v373_v57 = vld [vmem:[%s3002_s25 + $0x60] sm:$0xff]  ;;  %v374_v58 = vld [vmem:[%s3002_s25 + $0x68] sm:$0xff]  ;;  %v375_v60 = vld [vmem:[%s3002_s25 + $0x70] sm:$0xff] }
  0x93   :  { %v167_v9 = vld [vmem:[#allocation2 + $0x8] sm:$0xff]  ;;  %v168_v11 = vld [vmem:[#allocation2 + $0x10] sm:$0xff]  ;;  %v1806_v59 = vpack.c.bf16 %v374_v58, %v373_v57  ;;  %v376_v61 = vld [vmem:[%s3002_s25 + $0x78] sm:$0xff] }
  0x94   :  { %v163_v10 = vld [vmem:[#allocation2 + $0x7] sm:$0xff]  ;;  %191 = vrot.lane.b32.xlu1 %v167_v9, %s2213_s27  ;;  %v164_v12 = vld [vmem:[#allocation2 + $0xf] sm:$0xff]  ;;  %v165_v14 = vld [vmem:[#allocation2 + $0x1f] sm:$0xff]  ;;  %v1809_v62 = vpack.c.bf16 %v376_v61, %v375_v60 }
  0x95   :  { %175 = vrot.lane.b32.xlu0 %v163_v10, %s2206_s30  ;;  %1638 = vmatpush3.msra.mxu0 %v214_v8  ;;  %v166_v13 = vld [vmem:[#allocation2 + $0x27] sm:$0xff]  ;;  %v161_v30 = vld [vmem:[#allocation2 + $0x1e] sm:$0xff]  ;;  %v383_v8 = vld [vmem:[%s3002_s25 + $0xb0] sm:$0xff] }
  0x96   :  { %v170_v15 = vld [vmem:[#allocation2 + $0x28] sm:$0xff]  ;;  %v169_v16 = vld [vmem:[#allocation2 + $0x20] sm:$0xff]  ;;  %1792 = vmatpush1.bf16.msra.mxu1 %v1791_v43  ;;  %1645 = vmatprep.subr.mxu0 %v493_v46  ;;  %v384_v9 = vld [vmem:[%s3002_s25 + $0xb8] sm:$0xff] }
  0x97   :  { %v159_v17 = vld [vmem:[#allocation2 + $0x6] sm:$0xff]  ;;  %v160_v22 = vld [vmem:[#allocation2 + $0xe] sm:$0xff]  ;;  %1793 = vmatprep.subr.bf16.mxu1 %v2214_v40  ;;  %v1821_v10 = vpack.c.bf16 %v384_v9, %v383_v8  ;;  %v642_v49 = vld [vmem:[#allocation9] sm:$0xff] }
  0x98   :  { %193 = vrot.lane.b32.xlu1 %v168_v11, %s2213_s27  ;;  %v162_v29 = vld [vmem:[#allocation2 + $0x26] sm:$0xff]  ;;  %v1481_v11 = vld [vmem:[%s3003_s1] ss:$0 sm:$0xff] }
  0x99   :  { %177 = vrot.lane.b32.xlu0 %v164_v12, %s2206_s30  ;;  %v377_v63 = vld [vmem:[%s3002_s25 + $0x80] sm:$0xff]  ;;  %v378_v0 = vld [vmem:[%s3002_s25 + $0x88] sm:$0xff] }
  0x9a   :  { %1795 = vmatpush1.bf16.msra.mxu1 %v1794_v47  ;;  %v381_v5 = vld [vmem:[%s3002_s25 + $0xa0] sm:$0xff]  ;;  %v382_v6 = vld [vmem:[%s3002_s25 + $0xa8] sm:$0xff] }
  0x9b   :  { %1796 = vmatprep.subr.bf16.mxu1 %v2214_v40  ;;  %v1818_v7 = vpack.c.bf16 %v382_v6, %v381_v5  ;;  %v644_v51 = vld [vmem:[#allocation9 + $0x10] sm:$0xff]  ;;  %v646_v55 = vld [vmem:[#allocation9 + $0x20] sm:$0xff] }
  0x9c   :  { %181 = vrot.lane.b32.xlu1 %v166_v13, %s2206_s30  ;;  %v648_v58 = vld [vmem:[#allocation9 + $0x30] sm:$0xff]  ;;  %v650_v61 = vld [vmem:[#allocation9 + $0x40] sm:$0xff] }
  0x9d   :  { %179 = vrot.lane.b32.xlu0 %v165_v14, %s2206_s30  ;;  %v656_v6 = vld [vmem:[#allocation9 + $0x70] sm:$0xff]  ;;  %v658_v9 = vld [vmem:[#allocation9 + $0x80] sm:$0xff] }
  0x9e   :  { %1798 = vmatpush1.bf16.msra.mxu1 %v1797_v50  ;;  %v643_v50 = vld [vmem:[#allocation9 + $0x8] sm:$0xff] }
  0x9f   :  { %1799 = vmatprep.subr.bf16.mxu1 %v2214_v40  ;;  %v1824_v52 = vpack.c.bf16 %v643_v50, %v642_v49 }
  0xa0   :  { %197 = vrot.lane.b32.xlu1 %v170_v15, %s2213_s27 }
  0xa1   :  { %195 = vrot.lane.b32.xlu0 %v169_v16, %s2213_s27 }
  0xa2   :  { %1801 = vmatpush1.bf16.msra.mxu1 %v1800_v53  ;;  %v645_v53 = vld [vmem:[#allocation9 + $0x18] sm:$0xff] }
  0xa3   :  { %1802 = vmatprep.subr.bf16.mxu1 %v2214_v40  ;;  %v1827_v54 = vpack.c.bf16 %v645_v53, %v644_v51 }
  0xa6   :  { %1804 = vmatpush1.bf16.msra.mxu1 %v1803_v56  ;;  %v647_v56 = vld [vmem:[#allocation9 + $0x28] sm:$0xff] }
  0xa7   :  { %1805 = vmatprep.subr.bf16.mxu1 %v2214_v40  ;;  %v1830_v57 = vpack.c.bf16 %v647_v56, %v646_v55  ;;  %v790_v55 = vld [vmem:[%s2982_s9] sm:$0xff] }
  0xaa   :  { %1807 = vmatpush1.bf16.msra.mxu1 %v1806_v59  ;;  %v649_v59 = vld [vmem:[#allocation9 + $0x38] sm:$0xff] }
  0xab   :  { %1808 = vmatprep.subr.bf16.mxu1 %v2214_v40  ;;  %v1833_v60 = vpack.c.bf16 %v649_v59, %v648_v58  ;;  %v808_v58 = vld [vmem:[%s2982_s9 + $0x90] sm:$0xff]  ;;  %v809_v59 = vld [vmem:[%s2982_s9 + $0x98] sm:$0xff] }
  0xae   :  { %1810 = vmatpush1.bf16.msra.mxu1 %v1809_v62  ;;  %v651_v62 = vld [vmem:[#allocation9 + $0x48] sm:$0xff] }
  0xaf   :  { %1811 = vmatprep.subr.bf16.mxu1 %v2214_v40 }
 0x106   :  { %v192_v18 = vpop.permute.xlu1 %191 }
 0x107   :  { %v176_v19 = vpop.permute.xlu0 %175 }
 0x108   :  { %v203_v20 = vsel %vm154_vm0, %v159_v17, %v176_v19 }
 0x109   :  { %v208_v21 = vsel %vm207_vm1, %v203_v20, %v192_v18 }
 0x10a   :  { %1639 = vmatprep.mubr.msk.f32.mxu0 %vm222_vm2, %v208_v21  ;;  %v194_v23 = vpop.permute.xlu1 %193 }
 0x10b   :  { %v178_v24 = vpop.permute.xlu0 %177 }
 0x10c   :  { %v204_v25 = vsel %vm154_vm0, %v160_v22, %v178_v24 }
 0x10d   :  { %v209_v26 = vsel %vm207_vm1, %v204_v25, %v194_v23 }
 0x10e   :  { %1640 = vmatmul.mubr.msk.f32.vlgmr.msra.gmra.mrb[0].mxu0 %vm222_vm2, %v209_v26  ;;  %v182_v27 = vpop.permute.xlu1 %181 }
 0x10f   :  { %v180_v28 = vpop.permute.xlu0 %179  ;;  %v206_v31 = vsel %vm154_vm0, %v162_v29, %v182_v27  ;;  %1646 = vmatpush3.msra.mxu0 %v493_v46 }
 0x110   :  { %v205_v32 = vsel %vm154_vm0, %v161_v30, %v180_v28  ;;  %1823 = vmatprep.subr.bf16.mxu0 %v2214_v40 }
 0x112   :  { %v198_v33 = vpop.permute.xlu1 %197 }
 0x113   :  { %v196_v34 = vpop.permute.xlu0 %195  ;;  %v211_v35 = vsel %vm207_vm1, %v206_v31, %v198_v33 }
 0x114   :  { %v210_v36 = vsel %vm207_vm1, %v205_v32, %v196_v34 }
 0x115   :  { %1642 = vmatprep.mubr.msk.f32.mxu0 %vm222_vm2, %v210_v36 }
 0x116   :  { %1643 = vmatmul.mubr.msk.f32.gmra.mrb[2].mxu0 %vm222_vm2, %v211_v35 }
 0x117   :  { %1647 = vmatprep.mubr.msk.f32.mxu0 %vm154_vm0, %v150_v1  ;;  %v1812_v1 = vpack.c.bf16 %v378_v0, %v377_v63  ;;  %v1836_v63 = vpack.c.bf16 %v651_v62, %v650_v61  ;;  %v652_v0 = vld [vmem:[#allocation9 + $0x50] sm:$0xff]  ;;  %v1863_v62 = vpack.c.bf16 %v809_v59, %v808_v58  ;;  %v830_v58 = vld [vmem:[%s2982_s9 + $0x140] sm:$0xff] }
 0x118   :  { %v831_v59 = vld [vmem:[%s2982_s9 + $0x148] sm:$0xff] }
 0x119   :  { %1813 = vmatpush1.bf16.msra.mxu1 %v1812_v1  ;;  %v653_v1 = vld [vmem:[#allocation9 + $0x58] sm:$0xff] }
 0x11a   :  { %1648 = vmatmul.mubr.msk.f32.vlgmr.msra.gmra.mrb[4].mxu0 %vm154_vm0, %v2421_v2  ;;  %v379_v2 = vld [vmem:[%s3002_s25 + $0x90] sm:$0xff]  ;;  %1814 = vmatprep.subr.bf16.mxu1 %v2214_v40 }
 0x11b   :  { %1650 = vmatprep.mubr.msk.f32.mxu0 %vm154_vm0, %v2426_v3  ;;  %v380_v3 = vld [vmem:[%s3002_s25 + $0x98] sm:$0xff]  ;;  %s2215_s25 = smov 64   ;;  %1825 = vmatpush1.bf16.msra.mxu0 %v1824_v52 }
 0x11c   :  { %1826 = vmatprep.subr.bf16.mxu0 %v2214_v40 }
 0x11e   :  { %1651 = vmatmul.mubr.msk.f32.gmra.mrb[6].mxu0 %vm154_vm0, %v2434_v4  ;;  %v1815_v4 = vpack.c.bf16 %v380_v3, %v379_v2  ;;  %v1839_v2 = vpack.c.bf16 %v653_v1, %v652_v0  ;;  %v654_v3 = vld [vmem:[#allocation9 + $0x60] sm:$0xff]  ;;  %v823_v0 = vld [vmem:[%s2982_s9 + $0x108] sm:$0xff]  ;;  %v792_v1 = vld [vmem:[%s2982_s9 + $0x10] sm:$0xff] }
 0x11f   :  { %1828 = vmatpush1.bf16.msra.mxu0 %v1827_v54  ;;  %v806_v54 = vld [vmem:[%s2982_s9 + $0x80] sm:$0xff] }
 0x120   :  { %1816 = vmatpush1.bf16.msra.mxu1 %v1815_v4  ;;  %1829 = vmatprep.subr.bf16.mxu0 %v2214_v40  ;;  %v655_v4 = vld [vmem:[#allocation9 + $0x68] sm:$0xff] }
 0x121   :  { %1817 = vmatprep.subr.bf16.mxu1 %v2214_v40  ;;  %v1842_v5 = vpack.c.bf16 %v655_v4, %v654_v3  ;;  %v793_v4 = vld [vmem:[%s2982_s9 + $0x18] sm:$0xff] }
 0x123   :  { %1831 = vmatpush1.bf16.msra.mxu0 %v1830_v57  ;;  %v791_v57 = vld [vmem:[%s2982_s9 + $0x8] sm:$0xff] }
 0x124   :  { %1819 = vmatpush1.bf16.msra.mxu1 %v1818_v7  ;;  %1832 = vmatprep.subr.bf16.mxu0 %v2214_v40  ;;  %v657_v7 = vld [vmem:[#allocation9 + $0x78] sm:$0xff]  ;;  %v1861_v61 = vpack.c.bf16 %v791_v57, %v790_v55 }
 0x125   :  { %1820 = vmatprep.subr.bf16.mxu1 %v2214_v40  ;;  %v1845_v8 = vpack.c.bf16 %v657_v7, %v656_v6  ;;  %v811_v6 = vld [vmem:[%s2982_s9 + $0xa8] sm:$0xff]  ;;  %v1865_v7 = vpack.c.bf16 %v793_v4, %v792_v1  ;;  %v834_v1 = vld [vmem:[%s2982_s9 + $0x160] sm:$0xff]  ;;  %v817_v4 = vld [vmem:[%s2982_s9 + $0xd8] sm:$0xff] }
 0x127   :  { %1834 = vmatpush1.bf16.msra.mxu0 %v1833_v60 }
 0x128   :  { %1822 = vmatpush1.bf16.msra.mxu1 %v1821_v10  ;;  %1835 = vmatprep.subr.bf16.mxu0 %v2214_v40  ;;  %v659_v10 = vld [vmem:[#allocation9 + $0x88] sm:$0xff] }
 0x12b   :  { %1837 = vmatpush1.bf16.msra.mxu0 %v1836_v63  ;;  %v822_v63 = vld [vmem:[%s2982_s9 + $0x100] sm:$0xff] }
 0x12c   :  { %1838 = vmatprep.subr.bf16.mxu0 %v2214_v40  ;;  %v1891_v3 = vpack.c.bf16 %v823_v0, %v822_v63  ;;  %v833_v63 = vld [vmem:[%s2982_s9 + $0x158] sm:$0xff] }
 0x12f   :  { %1840 = vmatpush1.bf16.msra.mxu0 %v1839_v2 }
 0x130   :  { %1841 = vmatprep.subr.bf16.mxu0 %v2214_v40 }
 0x133   :  { %1843 = vmatpush1.bf16.msra.mxu0 %v1842_v5  ;;  %v810_v5 = vld [vmem:[%s2982_s9 + $0xa0] sm:$0xff] }
 0x134   :  { %1844 = vmatprep.subr.bf16.mxu0 %v2214_v40 }
 0x137   :  { %1846 = vmatpush1.bf16.msra.mxu0 %v1845_v8  ;;  %v1867_v8 = vpack.c.bf16 %v811_v6, %v810_v5 }
 0x138   :  { %1847 = vmatprep.subr.bf16.mxu0 %v2214_v40 }
 0x1e1   :  { %v1641_v12 = vpop.f32.mrb[0].mxu0 }
 0x1e2   :  { %v307_v13 = vadd.f32 %v1641_v12, %v1481_v11  ;;  %v301_v14 = vpop.f32.mrb[1].mxu0  ;;  %v660_v12 = vld [vmem:[#allocation9 + $0x90] sm:$0xff] }
 0x1e3   :  { %v302_v15 = vadd.f32 %v1481_v11, %v301_v14 }
 0x1e4   :  { %v321_v16 = vmax.f32 %v307_v13, 0.0  ;;  %v661_v13 = vld [vmem:[#allocation9 + $0x98] sm:$0xff] }
 0x1e5   :  { %v320_v17 = vmax.f32 %v302_v15, 0.0  ;;  %v1851_v14 = vpack.c.bf16 %v661_v13, %v660_v12  ;;  %v662_v15 = vld [vmem:[#allocation9 + $0xa0] sm:$0xff] }
 0x1e6   :  { %326 = vst.msk [vmem:[#allocation2 + $0x10] sm:$0xff] %vm324_vm3, %v321_v16  ;;  %v663_v16 = vld [vmem:[#allocation9 + $0xa8] sm:$0xff]  ;;  %v813_v12 = vld [vmem:[%s2982_s9 + $0xb8] sm:$0xff] }
 0x1e7   :  { %325 = vst.msk [vmem:[#allocation2 + $0x8] sm:$0xff] %vm324_vm3, %v320_v17  ;;  %v1854_v17 = vpack.c.bf16 %v663_v16, %v662_v15  ;;  %v796_v16 = vld [vmem:[%s2982_s9 + $0x30] sm:$0xff] }
 0x1e9   :  { %v1644_v18 = vpop.f32.mrb[2].mxu0 }
 0x1ea   :  { %v317_v19 = vadd.f32 %v1644_v18, %v1481_v11  ;;  %v311_v20 = vpop.f32.mrb[3].mxu0  ;;  %v664_v18 = vld [vmem:[#allocation9 + $0xb0] sm:$0xff] }
 0x1eb   :  { %v312_v21 = vadd.f32 %v1481_v11, %v311_v20  ;;  %v1848_v11 = vpack.c.bf16 %v659_v10, %v658_v9  ;;  %v794_v9 = vld [vmem:[%s2982_s9 + $0x20] sm:$0xff]  ;;  %v795_v10 = vld [vmem:[%s2982_s9 + $0x28] sm:$0xff] }
 0x1ec   :  { %v323_v22 = vmax.f32 %v317_v19, 0.0  ;;  %v665_v19 = vld [vmem:[#allocation9 + $0xb8] sm:$0xff] }
 0x1ed   :  { %v322_v23 = vmax.f32 %v312_v21, 0.0  ;;  %v338_v33 = vld [vmem:[#allocation2 + $0x10] sm:$0xff]  ;;  %v2576_v45 = vpop.f32.mrb[4].mxu0  ;;  %1849 = vmatpush1.bf16.msra.mxu0 %v1848_v11  ;;  %v1857_v20 = vpack.c.bf16 %v665_v19, %v664_v18  ;;  %v814_v18 = vld [vmem:[%s2982_s9 + $0xc0] sm:$0xff]  ;;  %v815_v19 = vld [vmem:[%s2982_s9 + $0xc8] sm:$0xff] }
 0x1ee   :  { %328 = vst.msk [vmem:[#allocation2 + $0x28] sm:$0xff] %vm324_vm3, %v323_v22  ;;  %v337_v24 = vld [vmem:[#allocation2 + $0x8] sm:$0xff]  ;;  %v2578_v46 = vpop.f32.mrb[5].mxu0  ;;  %1850 = vmatprep.subr.bf16.mxu0 %v2214_v40  ;;  %v1486_v21 = vld [vmem:[#allocation3] ss:$0 sm:$0xff] }
 0x1ef   :  { %v334_v25 = vld [vmem:[#allocation2 + $0xf] sm:$0xff]  ;;  %v333_v26 = vld [vmem:[#allocation2 + $0x7] sm:$0xff]  ;;  %327 = vst.msk [vmem:[#allocation2 + $0x20] sm:$0xff] %vm324_vm3, %v322_v23  ;;  %1487 = vmatprep.mubr.msk.f32.mxu1 %vm324_vm3, %v337_v24  ;;  %v1491_v22 = vld [vmem:[#allocation8] ss:$0 sm:$0xff] }
 0x1f0   :  { %347 = vrot.lane.b32.xlu1 %v334_v25, %s2215_s25  ;;  %345 = vrot.lane.b32.xlu0 %v333_v26, %s2215_s25  ;;  %v329_v30 = vld [vmem:[#allocation2 + $0x6] sm:$0xff]  ;;  %v330_v34 = vld [vmem:[#allocation2 + $0xe] sm:$0xff]  ;;  %v580_v26 = vadd.f32 %v1491_v22, %v2578_v46 }
 0x1f1   :  { %v2580_v47 = vpop.f32.mrb[6].mxu0  ;;  %1852 = vmatpush1.bf16.msra.mxu0 %v1851_v14  ;;  %v812_v11 = vld [vmem:[%s2982_s9 + $0xb0] sm:$0xff]  ;;  %v1869_v14 = vpack.c.bf16 %v795_v10, %v794_v9 }
 0x1f2   :  { %v2582_v48 = vpop.f32.mrb[7].mxu0  ;;  %1853 = vmatprep.subr.bf16.mxu0 %v2214_v40  ;;  %v595_v49 = vadd.f32 %v2580_v47, %v1491_v22  ;;  %v807_v47 = vld [vmem:[%s2982_s9 + $0x88] sm:$0xff]  ;;  %v1871_v15 = vpack.c.bf16 %v813_v12, %v812_v11  ;;  %v836_v10 = vld [vmem:[%s2982_s9 + $0x170] sm:$0xff]  ;;  %v837_v11 = vld [vmem:[%s2982_s9 + $0x178] sm:$0xff] }
 0x1f3   :  { %v1859_v56 = vpack.c.bf16 %v807_v47, %v806_v54  ;;  %v818_v12 = vld [vmem:[%s2982_s9 + $0xe0] sm:$0xff] }
 0x1f5   :  { %v340_v42 = vld [vmem:[#allocation2 + $0x28] sm:$0xff]  ;;  %1855 = vmatpush1.bf16.msra.mxu0 %v1854_v17  ;;  %1860 = vmatprep.subr.bf16.mxu1 %v1859_v56  ;;  %v797_v17 = vld [vmem:[%s2982_s9 + $0x38] sm:$0xff] }
 0x1f6   :  { %v336_v27 = vld [vmem:[#allocation2 + $0x27] sm:$0xff]  ;;  %v335_v28 = vld [vmem:[#allocation2 + $0x1f] sm:$0xff]  ;;  %1856 = vmatprep.subr.bf16.mxu0 %v2214_v40 }
 0x1f7   :  { %351 = vrot.lane.b32.xlu1 %v336_v27, %s2215_s25  ;;  %349 = vrot.lane.b32.xlu0 %v335_v28, %s2215_s25  ;;  %v339_v36 = vld [vmem:[#allocation2 + $0x20] sm:$0xff] }
 0x1f8   :  { %v331_v38 = vld [vmem:[#allocation2 + $0x1e] sm:$0xff]  ;;  %v332_v43 = vld [vmem:[#allocation2 + $0x26] sm:$0xff] }
 0x1f9   :  { %1858 = vmatpush1.bf16.msra.mxu0 %v1857_v20 }
 0x1fa   :  { %1892 = vmatprep.subr.bf16.mxu0 %v1891_v3 }
 0x262   :  { %v346_v29 = vpop.permute.xlu0 %345  ;;  %v348_v32 = vpop.permute.xlu1 %347 }
 0x263   :  { %v357_v31 = vsel %vm324_vm3, %v329_v30, %v346_v29  ;;  %v358_v35 = vsel %vm324_vm3, %v330_v34, %v348_v32  ;;  %v585_v32 = vadd.f32 %v2576_v45, %v1491_v22 }
 0x264   :  { %469 = vmatmul.mubr.f32.vlgmr.msra.gmra.mrb[0].mxu1 %v357_v31 }
 0x265   :  { %1488 = vmatprep.mubr.msk.f32.mxu1 %vm324_vm3, %v338_v33  ;;  %1862 = vmatpush3.bf16.msra.mxu1 %v1861_v61  ;;  %v1907_v61 = vpack.c.bf16 %v831_v59, %v830_v58  ;;  %v1024_v58 = vld [vmem:[#allocation14 + $0x28] sm:$0xff] }
 0x266   :  { %1864 = vmatprep.subr.bf16.mxu1 %v1863_v62  ;;  %v832_v62 = vld [vmem:[%s2982_s9 + $0x150] sm:$0xff] }
 0x267   :  { %v1911_v0 = vpack.c.bf16 %v833_v63, %v832_v62 }
 0x268   :  { %474 = vmatmul.mubr.f32.gmra.mrb[2].mxu1 %v358_v35 }
 0x269   :  { %1489 = vmatprep.mubr.msk.f32.mxu1 %vm324_vm3, %v339_v36  ;;  %v350_v37 = vpop.permute.xlu0 %349  ;;  %v352_v41 = vpop.permute.xlu1 %351  ;;  %1866 = vmatpush3.bf16.msra.mxu1 %v1865_v7  ;;  %v800_v7 = vld [vmem:[%s2982_s9 + $0x50] sm:$0xff] }
 0x26a   :  { %v359_v39 = vsel %vm324_vm3, %v331_v38, %v350_v37  ;;  %v360_v44 = vsel %vm324_vm3, %v332_v43, %v352_v41  ;;  %1868 = vmatprep.subr.bf16.mxu1 %v1867_v8  ;;  %v801_v8 = vld [vmem:[%s2982_s9 + $0x58] sm:$0xff] }
 0x26b   :  { %v1881_v9 = vpack.c.bf16 %v801_v8, %v800_v7 }
 0x26c   :  { %479 = vmatmul.mubr.f32.gmra.mrb[4].mxu1 %v359_v39  ;;  %v590_v39 = vadd.f32 %v1491_v22, %v2582_v48  ;;  %v1875_v22 = vpack.c.bf16 %v815_v19, %v814_v18  ;;  %v820_v19 = vld [vmem:[%s2982_s9 + $0xf0] sm:$0xff] }
 0x26d   :  { %1490 = vmatprep.mubr.msk.f32.mxu1 %vm324_vm3, %v340_v42  ;;  %1870 = vmatpush3.bf16.msra.mxu1 %v1869_v14  ;;  %v1919_v14 = vpack.c.bf16 %v837_v11, %v836_v10  ;;  %v1501_v10 = vld [vmem:[#allocation12] ss:$0 sm:$0xff] }
 0x26e   :  { %1872 = vmatprep.subr.bf16.mxu1 %v1871_v15 }
 0x270   :  { %484 = vmatmul.mubr.f32.gmra.mrb[6].mxu1 %v360_v44 }
 0x337   :  { %v470_v23 = vpop.f32.mrb[0].mxu1 }
 0x338   :  { %v471_v24 = vadd.f32 %v1486_v21, %v470_v23  ;;  %v472_v25 = vpop.f32.mrb[1].mxu1  ;;  %v798_v23 = vld [vmem:[%s2982_s9 + $0x40] sm:$0xff] }
 0x33a   :  { %v489_v27 = vmax.f32 %v471_v24, 0.0  ;;  %v799_v24 = vld [vmem:[%s2982_s9 + $0x48] sm:$0xff] }
 0x33b   :  { %v475_v28 = vpop.f32.mrb[2].mxu1  ;;  %v1877_v25 = vpack.c.bf16 %v799_v24, %v798_v23  ;;  %v805_v23 = vld [vmem:[%s2982_s9 + $0x78] sm:$0xff] }
 0x33c   :  { %v2596_v29 = vadd.f32 %v580_v26, %v489_v27  ;;  %v476_v30 = vadd.f32 %v1486_v21, %v475_v28  ;;  %v477_v31 = vpop.f32.mrb[3].mxu1  ;;  %v824_v26 = vld [vmem:[%s2982_s9 + $0x110] sm:$0xff]  ;;  %v825_v27 = vld [vmem:[%s2982_s9 + $0x118] sm:$0xff] }
 0x33d   :  { %v1895_v31 = vpack.c.bf16 %v825_v27, %v824_v26  ;;  %v1020_v26 = vld [vmem:[#allocation14 + $0x8] sm:$0xff] }
 0x33e   :  { %v602_v33 = vmax.f32 %v2596_v29, 0.0  ;;  %v490_v34 = vmax.f32 %v476_v30, 0.0 }
 0x33f   :  { %v480_v35 = vpop.f32.mrb[4].mxu1 }
 0x340   :  { %606 = vst.msk [vmem:[#allocation2 + $0x8] sm:$0xff] %vm324_vm3, %v602_v33  ;;  %v2603_v36 = vadd.f32 %v585_v32, %v490_v34  ;;  %v481_v37 = vadd.f32 %v1486_v21, %v480_v35  ;;  %v482_v38 = vpop.f32.mrb[5].mxu1  ;;  %v826_v34 = vld [vmem:[%s2982_s9 + $0x120] sm:$0xff]  ;;  %v827_v35 = vld [vmem:[%s2982_s9 + $0x128] sm:$0xff] }
 0x342   :  { %v603_v41 = vmax.f32 %v2603_v36, 0.0  ;;  %v491_v42 = vmax.f32 %v481_v37, 0.0 }
 0x343   :  { %v485_v43 = vpop.f32.mrb[6].mxu1 }
 0x344   :  { %607 = vst.msk [vmem:[#allocation2 + $0x10] sm:$0xff] %vm324_vm3, %v603_v41  ;;  %v2610_v44 = vadd.f32 %v590_v39, %v491_v42  ;;  %v486_v45 = vadd.f32 %v1486_v21, %v485_v43  ;;  %v487_v46 = vpop.f32.mrb[7].mxu1  ;;  %v1873_v21 = vpack.c.bf16 %v797_v17, %v796_v16  ;;  %v1899_v42 = vpack.c.bf16 %v827_v35, %v826_v34  ;;  %v802_v16 = vld [vmem:[%s2982_s9 + $0x60] sm:$0xff]  ;;  %v803_v17 = vld [vmem:[%s2982_s9 + $0x68] sm:$0xff] }
 0x345   :  { %v829_v46 = vld [vmem:[%s2982_s9 + $0x138] sm:$0xff]  ;;  %v1885_v18 = vpack.c.bf16 %v803_v17, %v802_v16 }
 0x346   :  { %v604_v50 = vmax.f32 %v2610_v44, 0.0  ;;  %v492_v51 = vmax.f32 %v486_v45, 0.0  ;;  %1874 = vmatpush3.bf16.msra.mxu1 %v1873_v21  ;;  %v828_v45 = vld [vmem:[%s2982_s9 + $0x130] sm:$0xff] }
 0x347   :  { %v618_v52 = vld [vmem:[#allocation2 + $0x8] sm:$0xff]  ;;  %1876 = vmatprep.subr.bf16.mxu1 %v1875_v22  ;;  %v804_v22 = vld [vmem:[%s2982_s9 + $0x70] sm:$0xff] }
 0x348   :  { %v614_v53 = vld [vmem:[#allocation2 + $0x6] sm:$0xff]  ;;  %608 = vst.msk [vmem:[#allocation2 + $0x20] sm:$0xff] %vm324_vm3, %v604_v50  ;;  %v2617_v48 = vadd.f32 %v595_v49, %v492_v51  ;;  %1497 = vmatprep.mubr.msk.f32.mxu0 %vm324_vm3, %v618_v52  ;;  %v1889_v24 = vpack.c.bf16 %v805_v23, %v804_v22  ;;  %v1502_v22 = vld [vmem:[%s2985_s12] ss:$0 sm:$0xff] }
 0x349   :  { %626 = vrot.lane.b32.xlu0 %v614_v53, %s2215_s25  ;;  %v610_v30 = vld [vmem:[#allocation2 + $0x4] sm:$0xff]  ;;  %v1903_v53 = vpack.c.bf16 %v829_v46, %v828_v45  ;;  %v1021_v46 = vld [vmem:[#allocation14 + $0x10] sm:$0xff] }
 0x34a   :  { %v605_v60 = vmax.f32 %v2617_v48, 0.0  ;;  %1878 = vmatpush3.bf16.msra.mxu1 %v1877_v25  ;;  %v1019_v25 = vld [vmem:[#allocation14] sm:$0xff] }
 0x34b   :  { %v615_v2 = vld [vmem:[#allocation2 + $0xe] sm:$0xff]  ;;  %v1923_v27 = vpack.c.bf16 %v1020_v26, %v1019_v25 }
 0x34c   :  { %609 = vst.msk [vmem:[#allocation2 + $0x28] sm:$0xff] %vm324_vm3, %v605_v60  ;;  %628 = vrot.lane.b32.xlu1 %v615_v2, %s2215_s25  ;;  %v619_v37 = vld [vmem:[#allocation2 + $0x10] sm:$0xff]  ;;  %v835_v2 = vld [vmem:[%s2982_s9 + $0x168] sm:$0xff] }
 0x34d   :  { %v611_v39 = vld [vmem:[#allocation2 + $0xc] sm:$0xff]  ;;  %v1915_v5 = vpack.c.bf16 %v835_v2, %v834_v1  ;;  %v1026_v1 = vld [vmem:[#allocation14 + $0x38] sm:$0xff] }
 0x34f   :  { %v616_v13 = vld [vmem:[#allocation2 + $0x1e] sm:$0xff] }
 0x350   :  { %630 = vrot.lane.b32.xlu0 %v616_v13, %s2215_s25  ;;  %v620_v49 = vld [vmem:[#allocation2 + $0x20] sm:$0xff]  ;;  %v819_v13 = vld [vmem:[%s2982_s9 + $0xe8] sm:$0xff] }
 0x351   :  { %v612_v52 = vld [vmem:[#allocation2 + $0x1c] sm:$0xff]  ;;  %v1883_v15 = vpack.c.bf16 %v819_v13, %v818_v12 }
 0x353   :  { %v617_v20 = vld [vmem:[#allocation2 + $0x26] sm:$0xff] }
 0x354   :  { %632 = vrot.lane.b32.xlu1 %v617_v20, %s2215_s25  ;;  %v621_v47 = vld [vmem:[#allocation2 + $0x28] sm:$0xff]  ;;  %v821_v20 = vld [vmem:[%s2982_s9 + $0xf8] sm:$0xff] }
 0x355   :  { %v613_v56 = vld [vmem:[#allocation2 + $0x24] sm:$0xff]  ;;  %v1887_v21 = vpack.c.bf16 %v821_v20, %v820_v19 }
 0x3bb   :  { %v627_v28 = vpop.permute.xlu0 %626 }
 0x3bc   :  { %v638_v32 = vsel %vm324_vm3, %v610_v30, %v627_v28  ;;  %v1496_v28 = vld [vmem:[#allocation11] ss:$0 sm:$0xff] }
 0x3bd   :  { %750 = vmatmul.mubr.f32.vlgmr.msra.gmra.mrb[8].mxu0 %v638_v32 }
 0x3be   :  { %1498 = vmatprep.mubr.msk.f32.mxu0 %vm324_vm3, %v619_v37  ;;  %1894 = vmatpush3.bf16.msra.mxu0 %v1891_v3  ;;  %v629_v38 = vpop.permute.xlu1 %628  ;;  %v816_v3 = vld [vmem:[%s2982_s9 + $0xd0] sm:$0xff] }
 0x3bf   :  { %1896 = vmatprep.subr.bf16.mxu0 %v1895_v31  ;;  %v639_v43 = vsel %vm324_vm3, %v611_v39, %v629_v38  ;;  %v1879_v6 = vpack.c.bf16 %v817_v4, %v816_v3 }
 0x3c1   :  { %755 = vmatmul.mubr.f32.gmra.mrb[10].mxu0 %v639_v43  ;;  %1880 = vmatprep.subr.bf16.mxu1 %v1879_v6 }
 0x3c2   :  { %1499 = vmatprep.mubr.msk.f32.mxu0 %vm324_vm3, %v620_v49  ;;  %1898 = vmatpush3.bf16.msra.mxu0 %v1895_v31  ;;  %v631_v51 = vpop.permute.xlu0 %630  ;;  %v1022_v49 = vld [vmem:[#allocation14 + $0x18] sm:$0xff] }
 0x3c3   :  { %1900 = vmatprep.subr.bf16.mxu0 %v1899_v42  ;;  %v640_v54 = vsel %vm324_vm3, %v612_v52, %v631_v51  ;;  %1882 = vmatpush3.bf16.msra.mxu1 %v1881_v9 }
 0x3c4   :  { %1884 = vmatprep.subr.bf16.mxu1 %v1883_v15 }
 0x3c5   :  { %760 = vmatmul.mubr.f32.gmra.mrb[12].mxu0 %v640_v54 }
 0x3c6   :  { %1500 = vmatprep.mubr.msk.f32.mxu0 %vm324_vm3, %v621_v47  ;;  %1902 = vmatpush3.bf16.msra.mxu0 %v1899_v42  ;;  %v633_v55 = vpop.permute.xlu1 %632  ;;  %v1927_v47 = vpack.c.bf16 %v1022_v49, %v1021_v46 }
 0x3c7   :  { %1904 = vmatprep.subr.bf16.mxu0 %v1903_v53  ;;  %v641_v57 = vsel %vm324_vm3, %v613_v56, %v633_v55  ;;  %1886 = vmatpush3.bf16.msra.mxu1 %v1885_v18 }
 0x3c8   :  { %1888 = vmatprep.subr.bf16.mxu1 %v1887_v21 }
 0x3c9   :  { %765 = vmatmul.mubr.f32.gmra.mrb[14].mxu0 %v641_v57  ;;  %v1023_v57 = vld [vmem:[#allocation14 + $0x20] sm:$0xff] }
 0x3ca   :  { %1906 = vmatpush3.bf16.msra.mxu0 %v1903_v53  ;;  %v1931_v63 = vpack.c.bf16 %v1024_v58, %v1023_v57 }
 0x3cb   :  { %1908 = vmatprep.subr.bf16.mxu0 %v1907_v61  ;;  %1890 = vmatpush3.bf16.msra.mxu1 %v1889_v24 }
 0x3cc   :  { %1924 = vmatprep.subr.bf16.mxu1 %v1923_v27 }
 0x3ce   :  { %1910 = vmatpush3.bf16.msra.mxu0 %v1907_v61 }
 0x3cf   :  { %1912 = vmatprep.subr.bf16.mxu0 %v1911_v0 }
 0x3d2   :  { %1914 = vmatpush3.bf16.msra.mxu0 %v1911_v0  ;;  %v1025_v0 = vld [vmem:[#allocation14 + $0x30] sm:$0xff] }
 0x3d3   :  { %1916 = vmatprep.subr.bf16.mxu0 %v1915_v5  ;;  %v1935_v4 = vpack.c.bf16 %v1026_v1, %v1025_v0 }
 0x3d6   :  { %1918 = vmatpush3.bf16.msra.mxu0 %v1915_v5 }
 0x3d7   :  { %1920 = vmatprep.subr.bf16.mxu0 %v1919_v14 }
 0x3da   :  { %1922 = vmatpush3.bf16.msra.mxu0 %v1919_v14 }
 0x3db   :  { %1939 = vmatprep.subr.bf16.mxu0 %v2214_v40 }
 0x490   :  { %v751_v30 = vpop.f32.mrb[8].mxu0 }
 0x491   :  { %v752_v31 = vadd.f32 %v1496_v28, %v751_v30  ;;  %v753_v32 = vpop.f32.mrb[9].mxu0 }
 0x493   :  { %v770_v34 = vmax.f32 %v752_v31, 0.0 }
 0x494   :  { %v756_v35 = vpop.f32.mrb[10].mxu0 }
 0x495   :  { %774 = vst [vmem:[#allocation2 + $0x8] sm:$0xff] %v770_v34  ;;  %v757_v37 = vadd.f32 %v1496_v28, %v756_v35  ;;  %v758_v38 = vpop.f32.mrb[11].mxu0  ;;  %1685 = vmatprep.mubr.f32.mxu0 %v770_v34 }
 0x497   :  { %v771_v39 = vmax.f32 %v757_v37, 0.0 }
 0x498   :  { %v761_v42 = vpop.f32.mrb[12].mxu0 }
 0x499   :  { %775 = vst [vmem:[#allocation2 + $0x10] sm:$0xff] %v771_v39  ;;  %v762_v43 = vadd.f32 %v1496_v28, %v761_v42  ;;  %v763_v45 = vpop.f32.mrb[13].mxu0  ;;  %1686 = vmatmul.mubr.f32.vlgmr.msra.gmra.mrb[16].mxu0 %v771_v39 }
 0x49b   :  { %v772_v51 = vmax.f32 %v762_v43, 0.0 }
 0x49c   :  { %v766_v52 = vpop.f32.mrb[14].mxu0  ;;  %v782_v53 = vld [vmem:[#allocation2 + $0x6] sm:$0xff] }
 0x49d   :  { %v778_v54 = vld [vmem:[#allocation2 + $0x4] sm:$0xff]  ;;  %776 = vst [vmem:[#allocation2 + $0x20] sm:$0xff] %v772_v51  ;;  %v767_v55 = vadd.f32 %v1496_v28, %v766_v52  ;;  %v768_v56 = vpop.f32.mrb[15].mxu0  ;;  %909 = vmatprep.mubr.f32.mxu1 %v782_v53  ;;  %1688 = vmatprep.mubr.f32.mxu0 %v772_v51 }
 0x49e   :  { %910 = vmatmul.mubr.f32.vlgmr.msra.gmra.mrb[8].mxu1 %v778_v54 }
 0x49f   :  { %v773_v59 = vmax.f32 %v767_v55, 0.0  ;;  %1926 = vmatpush3.bf16.msra.mxu1 %v1923_v27 }
 0x4a0   :  { %v783_v61 = vld [vmem:[#allocation2 + $0xe] sm:$0xff]  ;;  %1928 = vmatprep.subr.bf16.mxu1 %v1927_v47 }
 0x4a1   :  { %v779_v62 = vld [vmem:[#allocation2 + $0xc] sm:$0xff]  ;;  %777 = vst [vmem:[#allocation2 + $0x28] sm:$0xff] %v773_v59  ;;  %914 = vmatprep.mubr.f32.mxu1 %v783_v61  ;;  %1689 = vmatmul.mubr.f32.gmra.mrb[18].mxu0 %v773_v59 }
 0x4a2   :  { %915 = vmatmul.mubr.f32.gmra.mrb[10].mxu1 %v779_v62 }
 0x4a3   :  { %1930 = vmatpush3.bf16.msra.mxu1 %v1927_v47 }
 0x4a4   :  { %v784_v2 = vld [vmem:[#allocation2 + $0x1e] sm:$0xff]  ;;  %1932 = vmatprep.subr.bf16.mxu1 %v1931_v63 }
 0x4a5   :  { %v780_v3 = vld [vmem:[#allocation2 + $0x1c] sm:$0xff]  ;;  %919 = vmatprep.mubr.f32.mxu1 %v784_v2 }
 0x4a6   :  { %920 = vmatmul.mubr.f32.gmra.mrb[12].mxu1 %v780_v3 }
 0x4a7   :  { %1934 = vmatpush3.bf16.msra.mxu1 %v1931_v63 }
 0x4a8   :  { %v785_v5 = vld [vmem:[#allocation2 + $0x26] sm:$0xff]  ;;  %1936 = vmatprep.subr.bf16.mxu1 %v1935_v4 }
 0x4a9   :  { %v781_v6 = vld [vmem:[#allocation2 + $0x24] sm:$0xff]  ;;  %924 = vmatprep.mubr.f32.mxu1 %v785_v5 }
 0x4aa   :  { %925 = vmatmul.mubr.f32.gmra.mrb[14].mxu1 %v781_v6 }
 0x4ab   :  { %1938 = vmatpush3.bf16.msra.mxu1 %v1935_v4  ;;  %1707 = vmatprep.mubr.msk.f32.mxu1 %vm324_vm3, %v602_v33 }
 0x4ac   :  { %1963 = vmatprep.subr.bf16.mxu1 %v2214_v40 }
 0x4ae   :  { %1708 = vmatmul.mubr.msk.f32.vlgmr.msra.gmra.mrb[16].mxu1 %vm324_vm3, %v603_v41 }
 0x4af   :  { %1710 = vmatprep.mubr.msk.f32.mxu1 %vm324_vm3, %v604_v50 }
 0x4b2   :  { %1711 = vmatmul.mubr.msk.f32.gmra.mrb[18].mxu1 %vm324_vm3, %v605_v60 }
 0x56c   :  { %v1687_v7 = vpop.f32.mrb[16].mxu0 }
 0x56d   :  { %v996_v8 = vpop.f32.mrb[17].mxu0 }
 0x571   :  { %v1555_v9 = vpop.f32.mrb[8].mxu1 }
 0x572   :  { %v1556_v29 = vpop.f32.mrb[9].mxu1 }
 0x573   :  { %v1557_v33 = vadd.f32 %v1556_v29, %v1555_v9 }
 0x574   :  { %v1690_v11 = vpop.f32.mrb[18].mxu0 }
 0x575   :  { %v1558_v12 = vpop.f32.mrb[10].mxu1  ;;  %v912_v13 = vadd.f32 %v1557_v33, %v1501_v10  ;;  %v1006_v36 = vpop.f32.mrb[19].mxu0 }
 0x576   :  { %v1559_v14 = vpop.f32.mrb[11].mxu1 }
 0x577   :  { %v997_v41 = vadd.f32 %v996_v8, %v912_v13  ;;  %v1560_v15 = vadd.f32 %v1559_v14, %v1558_v12 }
 0x579   :  { %v917_v44 = vadd.f32 %v1560_v15, %v1501_v10  ;;  %v1561_v16 = vpop.f32.mrb[12].mxu1  ;;  %v1015_v28 = vmax.f32 %v997_v41, 0.0 }
 0x57a   :  { %v1562_v50 = vpop.f32.mrb[13].mxu1 }
 0x57b   :  { %v1563_v17 = vadd.f32 %v1562_v50, %v1561_v16  ;;  %v1002_v48 = vadd.f32 %v1687_v7, %v917_v44 }
 0x57d   :  { %v1564_v18 = vpop.f32.mrb[14].mxu1  ;;  %v922_v60 = vadd.f32 %v1563_v17, %v1501_v10  ;;  %v1016_v27 = vmax.f32 %v1002_v48, 0.0 }
 0x57e   :  { %v1565_v19 = vpop.f32.mrb[15].mxu1 }
 0x57f   :  { %v1007_v20 = vadd.f32 %v1006_v36, %v922_v60  ;;  %v1566_v21 = vadd.f32 %v1565_v19, %v1564_v18 }
 0x581   :  { %v927_v23 = vadd.f32 %v1566_v21, %v1501_v10  ;;  %v1709_v24 = vpop.f32.mrb[16].mxu1  ;;  %v1017_v43 = vmax.f32 %v1007_v20, 0.0 }
 0x582   :  { %v1118_v25 = vadd.f32 %v1709_v24, %v1502_v22  ;;  %v1112_v26 = vpop.f32.mrb[17].mxu1 }
 0x583   :  { %v1113_v30 = vadd.f32 %v1502_v22, %v1112_v26  ;;  %v1012_v31 = vadd.f32 %v1690_v11, %v927_v23 }
 0x584   :  { %v2796_v32 = vadd.f32 %v1118_v25, %v1016_v27 }
 0x585   :  { %v1712_v34 = vpop.f32.mrb[18].mxu1  ;;  %v2798_v35 = vadd.f32 %v1113_v30, %v1015_v28  ;;  %v1018_v37 = vmax.f32 %v1012_v31, 0.0 }
 0x586   :  { %v1128_v38 = vadd.f32 %v1712_v34, %v1502_v22  ;;  %v1122_v39 = vpop.f32.mrb[19].mxu1  ;;  %v1136_v42 = vmax.f32 %v2796_v32, 0.0 }
 0x587   :  { %v1123_v45 = vadd.f32 %v1502_v22, %v1122_v39  ;;  %v1135_v46 = vmax.f32 %v2798_v35, 0.0 }
 0x588   :  { %1141 = vadd.xlane.f32.xlu1 %v1136_v42  ;;  %v2804_v49 = vadd.f32 %v1128_v38, %v1018_v37 }
 0x589   :  { %1139 = vadd.xlane.f32.xlu0 %v1135_v46  ;;  %v2808_v51 = vadd.f32 %v1123_v45, %v1017_v43 }
 0x58a   :  { %v1138_v53 = vmax.f32 %v2804_v49, 0.0  ;;  %v1269_v49 = vld [vmem:[%s2988_s15] sm:$0xff] }
 0x58b   :  { %v1137_v52 = vmax.f32 %v2808_v51, 0.0 }
 0x58d   :  { %1143 = vadd.xlane.f32.xlu0 %v1137_v52 }
 0x591   :  { %1145 = vadd.xlane.f32.xlu0 %v1138_v53 }
 0x615   :  { %v1142_v54 = vpop.xlane.xlu1 %1141 }
 0x616   :  { %v1149_v47 = vmul.f32 0.0078125, %v1142_v54  ;;  %v1140_v55 = vpop.xlane.xlu0 %1139 }
 0x617   :  { %v1148_v56 = vmul.f32 0.0078125, %v1140_v55 }
 0x619   :  { %v1152_v57 = vmax.f32 %v1148_v56, %v1149_v47 }
 0x61a   :  { %v1144_v58 = vpop.xlane.xlu0 %1143 }
 0x61b   :  { %v1153_v59 = vrot.slane %v1152_v57, 4  ;;  %v1150_v0 = vmul.f32 0.0078125, %v1144_v58 }
 0x61d   :  { %v1154_v61 = vmax.f32 %v1152_v57, %v1153_v59 }
 0x61e   :  { %v1146_v62 = vpop.xlane.xlu0 %1145 }
 0x61f   :  { %v1155_v63 = vrot.slane %v1154_v61, 2  ;;  %v1151_v1 = vmul.f32 0.0078125, %v1146_v62 }
 0x621   :  { %v1156_v2 = vmax.f32 %v1154_v61, %v1155_v63  ;;  %v1159_v3 = vmax.f32 %v1150_v0, %v1151_v1 }
 0x623   :  { %v1157_v4 = vrot.slane %v1156_v2, 1  ;;  %v1160_v5 = vrot.slane %v1159_v3, 4 }
 0x625   :  { %v1158_v6 = vmax.f32 %v1156_v2, %v1157_v4  ;;  %v1161_v7 = vmax.f32 %v1159_v3, %v1160_v5  ;;  %v1272_v5 = vld [vmem:[%s2988_s15 + $0x18] sm:$0xff] }
 0x627   :  { %v1166_v8 = vsub.f32 %v1148_v56, %v1158_v6  ;;  %v1167_v9 = vsub.f32 %v1149_v47, %v1158_v6  ;;  %v1162_v29 = vrot.slane %v1161_v7, 2 }
 0x629   :  { %v1170_v10 = vmul.f32 1.442695, %v1166_v8  ;;  %v1172_v33 = vmul.f32 1.442695, %v1167_v9  ;;  %v1163_v11 = vmax.f32 %v1161_v7, %v1162_v29 }
 0x62b   :  { %2002 = vpow2.f32 %v1170_v10  ;;  %v1164_v12 = vrot.slane %v1163_v11, 1 }
 0x62c   :  { %2004 = vpow2.f32 %v1172_v33 }
 0x62d   :  { %v1165_v13 = vmax.f32 %v1163_v11, %v1164_v12 }
 0x62f   :  { %v1168_v36 = vsub.f32 %v1150_v0, %v1165_v13  ;;  %v1169_v14 = vsub.f32 %v1151_v1, %v1165_v13 }
 0x631   :  { %v1174_v41 = vmul.f32 1.442695, %v1168_v36  ;;  %v1176_v15 = vmul.f32 1.442695, %v1169_v14  ;;  %v1273_v14 = vld [vmem:[%s2988_s15 + $0x20] sm:$0xff] }
 0x633   :  { %2006 = vpow2.f32 %v1174_v41  ;;  %v1274_v41 = vld [vmem:[%s2988_s15 + $0x28] sm:$0xff] }
 0x634   :  { %2008 = vpow2.f32 %v1176_v15  ;;  %v1946_v15 = vpack.c.bf16 %v1274_v41, %v1273_v14 }
 0x635   :  { %v2003_v44 = vpop.eup %2002 }
 0x636   :  { %v2005_v16 = vpop.eup %2004 }
 0x637   :  { %v1178_v50 = vadd.f32 %v2005_v16, %v2003_v44 }
 0x639   :  { %v1179_v17 = vrot.slane %v1178_v50, 4 }
 0x63b   :  { %v1180_v48 = vadd.f32 %v1179_v17, %v1178_v50  ;;  %v1277_v17 = vld [vmem:[%s2988_s15 + $0x40] sm:$0xff] }
 0x63d   :  { %v2007_v18 = vpop.eup %2006  ;;  %v1181_v60 = vrot.slane %v1180_v48, 2 }
 0x63e   :  { %v2009_v19 = vpop.eup %2008 }
 0x63f   :  { %v1182_v20 = vadd.f32 %v1181_v60, %v1180_v48  ;;  %v1185_v21 = vadd.f32 %v2009_v19, %v2007_v18  ;;  %v1278_v48 = vld [vmem:[%s2988_s15 + $0x48] sm:$0xff]  ;;  %v1279_v60 = vld [vmem:[%s2988_s15 + $0x50] sm:$0xff] }
 0x641   :  { %v1183_v22 = vrot.slane %v1182_v20, 1  ;;  %v1186_v23 = vrot.slane %v1185_v21, 4 }
 0x643   :  { %v1184_v24 = vadd.f32 %v1183_v22, %v1182_v20  ;;  %v1187_v25 = vadd.f32 %v1186_v23, %v1185_v21  ;;  %v1281_v21 = vld [vmem:[%s2988_s15 + $0x60] sm:$0xff]  ;;  %v1282_v22 = vld [vmem:[%s2988_s15 + $0x68] sm:$0xff] }
 0x644   :  { %v1958_v23 = vpack.c.bf16 %v1282_v22, %v1281_v21 }
 0x645   :  { %2010 = vrcp.f32 %v1184_v24  ;;  %v1188_v26 = vrot.slane %v1187_v25, 2  ;;  %v1283_v24 = vld [vmem:[%s2988_s15 + $0x70] sm:$0xff] }
 0x647   :  { %v1189_v27 = vadd.f32 %v1188_v26, %v1187_v25  ;;  %v1284_v25 = vld [vmem:[%s2988_s15 + $0x78] sm:$0xff]  ;;  %v2016_v26 = vld [vmem:[#allocation2] sm:$0xff] }
 0x648   :  { %1745 = vmatprep.mubr.msk.f32.mxu0 %vm2216_vm6, %v2016_v26  ;;  %1780 = vmatprep.mubr.msk.f32.mxu1 %vm2216_vm6, %v2016_v26 }
 0x649   :  { %v1190_v28 = vrot.slane %v1189_v27, 1 }
 0x64b   :  { %v1191_v30 = vadd.f32 %v1190_v28, %v1189_v27  ;;  %v1961_v27 = vpack.c.bf16 %v1284_v25, %v1283_v24  ;;  %v1368_v28 = vld [vmem:[%s2990_s17] sm:$0xff] }
 0x64d   :  { %2012 = vrcp.f32 %v1191_v30  ;;  %v1369_v30 = vld [vmem:[%s2990_s17 + $0x8] sm:$0xff] }
 0x64f   :  { %v2011_v31 = vpop.eup %2010 }
 0x650   :  { %v1193_v34 = vmul.f32 %v2011_v31, %v2003_v44  ;;  %v1194_v37 = vmul.f32 %v2011_v31, %v2005_v16  ;;  %v1275_v44 = vld [vmem:[%s2988_s15 + $0x30] sm:$0xff]  ;;  %v1276_v16 = vld [vmem:[%s2988_s15 + $0x38] sm:$0xff] }
 0x651   :  { %v1949_v50 = vpack.c.bf16 %v1276_v16, %v1275_v44  ;;  %v1370_v31 = vld [vmem:[%s2990_s17 + $0x10] sm:$0xff] }
 0x652   :  { %v1198_v38 = vmul.f32 %v1193_v34, %v1135_v46  ;;  %v1199_v39 = vmul.f32 %v1194_v37, %v1136_v42  ;;  %v1964_v34 = vpack.c.bf16 %v1369_v30, %v1368_v28  ;;  %v1371_v37 = vld [vmem:[%s2990_s17 + $0x18] sm:$0xff] }
 0x654   :  { %v1202_v43 = vadd.f32 %v1199_v39, %v1198_v38  ;;  %1965 = vmatpush3.bf16.msra.mxu1 %v1964_v34  ;;  %v1967_v38 = vpack.c.bf16 %v1371_v37, %v1370_v31  ;;  %v1372_v39 = vld [vmem:[%s2990_s17 + $0x20] sm:$0xff] }
 0x655   :  { %1966 = vmatprep.subr.bf16.mxu1 %v2214_v40 }
 0x656   :  { %v1203_v45 = vrot.slane %v1202_v43, 4 }
 0x657   :  { %v2013_v54 = vpop.eup %2012 }
 0x658   :  { %v1197_v47 = vmul.f32 %v2013_v54, %v2009_v19  ;;  %v1196_v55 = vmul.f32 %v2013_v54, %v2007_v18  ;;  %v1204_v56 = vadd.f32 %v1203_v45, %v1202_v43  ;;  %v1952_v18 = vpack.c.bf16 %v1278_v48, %v1277_v17  ;;  %v1280_v19 = vld [vmem:[%s2988_s15 + $0x58] sm:$0xff]  ;;  %v1373_v43 = vld [vmem:[%s2990_s17 + $0x28] sm:$0xff]  ;;  %1968 = vmatpush3.bf16.msra.mxu1 %v1967_v38  ;;  %v1374_v54 = vld [vmem:[%s2990_s17 + $0x30] sm:$0xff] }
 0x659   :  { %v1955_v20 = vpack.c.bf16 %v1280_v19, %v1279_v60  ;;  %v1970_v45 = vpack.c.bf16 %v1373_v43, %v1372_v39  ;;  %1969 = vmatprep.subr.bf16.mxu1 %v2214_v40 }
 0x65a   :  { %v1200_v57 = vmul.f32 %v1196_v55, %v1137_v52  ;;  %v1201_v58 = vmul.f32 %v1197_v47, %v1138_v53  ;;  %v1205_v59 = vrot.slane %v1204_v56, 2  ;;  %v1270_v52 = vld [vmem:[%s2988_s15 + $0x8] sm:$0xff]  ;;  %v1271_v53 = vld [vmem:[%s2988_s15 + $0x10] sm:$0xff]  ;;  %v1375_v47 = vld [vmem:[%s2990_s17 + $0x38] sm:$0xff] }
 0x65b   :  { %v1940_v4 = vpack.c.bf16 %v1270_v52, %v1269_v49  ;;  %v1943_v6 = vpack.c.bf16 %v1272_v5, %v1271_v53  ;;  %v1973_v55 = vpack.c.bf16 %v1375_v47, %v1374_v54 }
 0x65c   :  { %v1209_v61 = vadd.f32 %v1201_v58, %v1200_v57  ;;  %v1206_v35 = vadd.f32 %v1205_v59, %v1204_v56  ;;  %1971 = vmatpush3.bf16.msra.mxu1 %v1970_v45  ;;  %v1376_v56 = vld [vmem:[%s2990_s17 + $0x40] sm:$0xff]  ;;  %v1377_v57 = vld [vmem:[%s2990_s17 + $0x48] sm:$0xff]  ;;  %v1378_v59 = vld [vmem:[%s2990_s17 + $0x50] sm:$0xff] }
 0x65d   :  { %1941 = vmatpush3.bf16.msra.mxu0 %v1940_v4  ;;  %1972 = vmatprep.subr.bf16.mxu1 %v2214_v40  ;;  %v1976_v58 = vpack.c.bf16 %v1377_v57, %v1376_v56 }
 0x65e   :  { %v1210_v62 = vrot.slane %v1209_v61, 4  ;;  %v1207_v32 = vrot.slane %v1206_v35, 1  ;;  %1942 = vmatprep.subr.bf16.mxu0 %v2214_v40 }
 0x660   :  { %v1211_v46 = vadd.f32 %v1210_v62, %v1209_v61  ;;  %v1208_v1 = vadd.f32 %v1207_v32, %v1206_v35  ;;  %1974 = vmatpush3.bf16.msra.mxu1 %v1973_v55  ;;  %v1379_v61 = vld [vmem:[%s2990_s17 + $0x58] sm:$0xff]  ;;  %v1380_v35 = vld [vmem:[%s2990_s17 + $0x60] sm:$0xff] }
 0x661   :  { %1944 = vmatpush3.bf16.msra.mxu0 %v1943_v6  ;;  %1975 = vmatprep.subr.bf16.mxu1 %v2214_v40  ;;  %v1979_v62 = vpack.c.bf16 %v1379_v61, %v1378_v59 }
 0x662   :  { %v1212_v63 = vrot.slane %v1211_v46, 2  ;;  %1945 = vmatprep.subr.bf16.mxu0 %v2214_v40 }
 0x664   :  { %v1213_v42 = vadd.f32 %v1212_v63, %v1211_v46  ;;  %1977 = vmatpush3.bf16.msra.mxu1 %v1976_v58  ;;  %v1381_v46 = vld [vmem:[%s2990_s17 + $0x68] sm:$0xff] }
 0x665   :  { %1947 = vmatpush3.bf16.msra.mxu0 %v1946_v15  ;;  %1978 = vmatprep.subr.bf16.mxu1 %v2214_v40  ;;  %v1982_v63 = vpack.c.bf16 %v1381_v46, %v1380_v35 }
 0x666   :  { %v1214_v0 = vrot.slane %v1213_v42, 1  ;;  %1948 = vmatprep.subr.bf16.mxu0 %v2214_v40 }
 0x668   :  { %v1215_v2 = vadd.f32 %v1214_v0, %v1213_v42  ;;  %1980 = vmatpush3.bf16.msra.mxu1 %v1979_v62 }
 0x669   :  { %1950 = vmatpush3.bf16.msra.mxu0 %v1949_v50  ;;  %1981 = vmatprep.subr.bf16.mxu1 %v2214_v40 }
 0x66a   :  { %v1219_v3 = vsel %vm1218_vm4, %v1215_v2, %v1208_v1  ;;  %1951 = vmatprep.subr.bf16.mxu0 %v2214_v40 }
 0x66b   :  { %v1222_v51 = vsel %vm1221_vm5, %v1219_v3, 0.0 }
 0x66c   :  { %1223 = vadd.xlane.f32.xlu1 %v1222_v51  ;;  %1983 = vmatpush3.bf16.msra.mxu1 %v1982_v63  ;;  %v1507_v51 = vld [vmem:[%s2986_s13] ss:$0 sm:$0xff] }
 0x66d   :  { %1953 = vmatpush3.bf16.msra.mxu0 %v1952_v18  ;;  %1984 = vmatprep.subr.bf16.mxu1 %v2214_v40 }
 0x66e   :  { %1954 = vmatprep.subr.bf16.mxu0 %v2214_v40 }
 0x671   :  { %1956 = vmatpush3.bf16.msra.mxu0 %v1955_v20 }
 0x672   :  { %1957 = vmatprep.subr.bf16.mxu0 %v2214_v40 }
 0x675   :  { %1959 = vmatpush3.bf16.msra.mxu0 %v1958_v23 }
 0x676   :  { %1960 = vmatprep.subr.bf16.mxu0 %v2214_v40  ;;  %v1508_v40 = vld [vmem:[%s2987_s14] ss:$0 sm:$0xff] }
 0x679   :  { %1962 = vmatpush3.bf16.msra.mxu0 %v1961_v27 }
 0x6f9   :  { %v1224_v7 = vpop.xlane.xlu1 %1223 }
 0x6fa   :  { %v1225_v8 = vmul.f32 0.0078125, %v1224_v7 }
 0x6fc   :  { %v1227_v9 = vrot.slane %v1225_v8, 1  ;;  %v2840_v29 = vsub.f32 %v1208_v1, %v1225_v8  ;;  %v1382_v8 = vld [vmem:[%s2990_s17 + $0x70] sm:$0xff] }
 0x6fe   :  { %v2842_v10 = vsub.f32 %v1215_v2, %v1227_v9  ;;  %v1232_v11 = vmul.f32 %v2840_v29, %v2840_v29  ;;  %v1383_v9 = vld [vmem:[%s2990_s17 + $0x78] sm:$0xff]  ;;  %s2171_s17 = scalar_lea.vmem %s1470_s23, 32 }
 0x6ff   :  { %p2172_p0 = scmp.ne.s32.totalorder %s1470_s23, %s2171_s17  ;;  %p2177_p2 = scmp.lt.s32.totalorder %s2171_s17, %s2171_s17 }
 0x700   :  { %v1233_v33 = vmul.f32 %v2842_v10, %v2842_v10 }
 0x701   :  { %p2178_p3 = por %p2177_p2, %p2176_p1 }
 0x702   :  { %v1236_v12 = vrot.slane %v1233_v33, 7 }
 0x703   :  { %p2179_p4 = pnand %p2178_p3, %p2172_p0 }
 0x704   :  { %v1237_v13 = vsel %vm1218_vm4, %v1236_v12, %v1232_v11 }
 0x705   :  { %v1239_v36 = vsel %vm1221_vm5, %v1237_v13, 0.0 }
 0x706   :  { %1240 = vadd.xlane.f32.xlu0 %v1239_v36  ;;  %v1510_v36 = vld [vmem:[%s2991_s18] ss:$0 sm:$0xff] }
 0x793   :  { %v1241_v32 = vpop.xlane.xlu0 %1240 }
 0x794   :  { %v1242_v42 = vmul.f32 0.0078125, %v1241_v32 }
 0x796   :  { %v1243_v0 = vadd.f32 1e-05, %v1242_v42 }
 0x798   :  { %2014 = vrsqrt.f32 %v1243_v0 }
 0x7a2   :  { %v2015_v1 = vpop.eup %2014 }
 0x7a3   :  { %v1246_v2 = vrot.slane %v2015_v1, 1  ;;  %v1249_v3 = vmul.f32 %v2015_v1, %v2840_v29  ;;  %v1985_v29 = vpack.c.bf16 %v1383_v9, %v1382_v8 }
 0x7a5   :  { %v1250_v49 = vmul.f32 %v1246_v2, %v2842_v10  ;;  %v1258_v52 = vmul.f32 %v1507_v51, %v1249_v3  ;;  %1986 = vmatpush3.bf16.msra.mxu1 %v1985_v29  ;;  %v1509_v10 = vld [vmem:[%s2989_s16] ss:$0 sm:$0xff] }
 0x7a7   :  { %v1259_v53 = vmul.f32 %v1507_v51, %v1250_v49  ;;  %v1267_v5 = vadd.f32 %v1508_v40, %v1258_v52 }
 0x7a9   :  { %v1268_v4 = vadd.f32 %v1508_v40, %v1259_v53 }
 0x7ab   :  { %v1294_v6 = vrot.slane %v1268_v4, 7 }
 0x7ad   :  { %v1295_v7 = vsel %vm1218_vm4, %v1294_v6, %v1267_v5 }
 0x7ae   :  { %1746 = vmatmul.mubr.f32.vlgmr.msra.gmra.mrb[20].mxu0 %v1295_v7 }
 0x881   :  { %v1363_v33 = vpop.f32.mrb[20].mxu0 }
 0x882   :  { %v1364_v11 = vadd.f32 %v1509_v10, %v1363_v33  ;;  %v1747_v12 = vpop.f32.mrb[21].mxu0 }
 0x884   :  { %v1367_v13 = vmax.f32 %v1364_v11, 0.0 }
 0x886   :  { %1781 = vmatmul.mubr.f32.vlgmr.msra.gmra.mrb[20].mxu1 %v1367_v13 }
 0x959   :  { %v1457_v14 = vpop.f32.mrb[20].mxu1 }
 0x95a   :  { %v1458_v41 = vadd.f32 %v1510_v36, %v1457_v14  ;;  %v1782_v15 = vpop.f32.mrb[21].mxu1 }
 0x95c   :  { %1462 = vst.msk [vmem:[#allocation15] sm:$0x3] %vm1461_vm7, %v1458_v41 }
 0x95d   :  { %2182 = shalt.err (!%p2179_p4)
}
 0x95e   :  { %s2183_s24 = scalar_lea.hbm %s2992_s19, 32 }
 0x95f   :  { %p2184_p5 = scmp.ne.s32.totalorder %s2992_s19, %s2183_s24  ;;  %p2187_p6 = scmp.lt.u32.totalorder %s2183_s24, %s2992_s19 }
 0x961   :  { %p2189_p7 = pnand %p2187_p6, %p2184_p5 }
 0x963   :  { %2192 = shalt.err (!%p2189_p7)
}
 0x964   :  { %1472 = dma.vmem_to_hbm [thread:$0]  %s1470_s23, 32, %s2992_s19, [#allocation5]  }
 0x965   :  { %2201 = dma.done.wait [#allocation5], 32  }
 0x966   :  { %2202 = vsyncadd [#allocation5], 4294967264 }
 0x967   :  { %1476 = vsyncpa [#allocation4], 1 }
 0x968   :  { %1477 = vsyncpa [#allocation7], 1 }
 0x969   :  { %1478 = vsyncpa [#allocation10], 1 }
 0x96a   :  { %1479 = vsyncpa [#allocation13], 1 }
 0x96b   :  { %1480 = vsyncpa [#allocation5], 1 }

</bundles_post_ra>
